<compile_context>
chip_gen: v7x
topology: tpu7x:2x2x1
jax: 0.10.0
libtpu: 0.0.40
codegen_flags: <defaults>
</compile_context>

<pallas_src>
import functools

import jax
import jax.numpy as jnp
from jax.experimental import pallas as pl
from jax.experimental.pallas import tpu as pltpu

# ---- module hyperparameters (synthetic, deterministic) ----------------------
POP_SIZE = 16     # LSTM input size
CELL_SIZE = 32    # LSTM hidden size
LAYERS_NUM = 2    # stacked LSTM layers
OUT_SIZE = 30     # mu / sigma output size
SEQ = 8
BATCH = 2


# -----------------------------------------------------------------------------
# Fused Pallas kernel: 2-layer LSTM over the whole sequence + packed heads
# -----------------------------------------------------------------------------
def _policy_kernel(x_ref, h0_ref, c0_ref,
                   wih0_ref, whh0_ref, b0_ref,
                   wih1_ref, whh1_ref, b1_ref,
                   whd_ref, bhd_ref,
                   out_ref, hN_ref, cN_ref,
                   y0_sc, y1_sc):
    """Everything in one launch.  x_ref is the flattened (S*B, D) input."""
    SB, _ = x_ref.shape
    _, B, H = h0_ref.shape
    S = SB // B

    def run_layer(gx, whh, h, c, y_out):
        # gx: (S*B, 4H) hoisted input projection (bias already added).
        # Sequential recurrence: only h @ W_hh + gate math on the critical path.
        for t in range(S):
            gates = gx[t * B:(t + 1) * B, :] + jnp.dot(
                h, whh, preferred_element_type=jnp.float32)          # (B, 4H)
            sg = jax.nn.sigmoid(gates)        # one EUP pass over all 4H lanes
            th = jnp.tanh(gates)              # one EUP pass over all 4H lanes
            # PyTorch gate order [i, f, g, o]
            c = sg[:, H:2 * H] * c + sg[:, 0:H] * th[:, 2 * H:3 * H]
            h = sg[:, 3 * H:4 * H] * jnp.tanh(c)
            y_out[t * B:(t + 1) * B, :] = h
        return h, c

    whh0 = whh0_ref[...]
    whh1 = whh1_ref[...]

    # ---- layer 0: hoisted input projection (one matmul over the sequence) ---
    gx0 = (jnp.dot(x_ref[...], wih0_ref[...],
                   preferred_element_type=jnp.float32) + b0_ref[...])
    h_fin0, c_fin0 = run_layer(gx0, whh0, h0_ref[0], c0_ref[0], y0_sc)

    # ---- layer 1: input projection over layer-0 outputs (kept in VMEM) ------
    gx1 = (jnp.dot(y0_sc[...], wih1_ref[...],
                   preferred_element_type=jnp.float32) + b1_ref[...])
    h_fin1, c_fin1 = run_layer(gx1, whh1, h0_ref[1], c0_ref[1], y1_sc)

    # ---- heads: one matmul against concat(W_mu, W_sigma) --------------------
    z = (jnp.dot(y1_sc[...], whd_ref[...],
                 preferred_element_type=jnp.float32) + bhd_ref[...])  # (S*B, 2O)
    O = whd_ref.shape[-1] // 2
    lane = jax.lax.broadcasted_iota(jnp.int32, z.shape, dimension=1)
    out_ref[...] = jnp.where(lane >= O, jax.nn.sigmoid(z), z)

    # ---- final hidden / cell states ------------------------------------------
    hN_ref[0] = h_fin0
    hN_ref[1] = h_fin1
    cN_ref[0] = c_fin0
    cN_ref[1] = c_fin1


# -----------------------------------------------------------------------------
# Wrapper
# -----------------------------------------------------------------------------
@jax.jit
def policy_net_forward(params, x, h, c):
    """Equivalent of PolicyNet.forward(x, h, c)."""
    assert LAYERS_NUM == 2
    S, B, D = x.shape
    H = CELL_SIZE
    O = OUT_SIZE

    x_flat = x.reshape(S * B, D)
    p0, p1 = params["lstm"]
    whd = jnp.concatenate([params["mu"]["w_t"], params["sigma"]["w_t"]], axis=1)
    bhd = jnp.concatenate([params["mu"]["b"], params["sigma"]["b"]], axis=1)

    out_shapes = (
        jax.ShapeDtypeStruct((S * B, 2 * O), jnp.float32),        # packed mu||sigma
        jax.ShapeDtypeStruct((LAYERS_NUM, B, H), jnp.float32),    # h_
        jax.ShapeDtypeStruct((LAYERS_NUM, B, H), jnp.float32),    # c_
    )
    grid_spec = pltpu.PrefetchScalarGridSpec(
        num_scalar_prefetch=0,
        grid=(1,),
        in_specs=[
            pl.BlockSpec((S * B, D), lambda i: (0, 0)),                 # x_flat
            pl.BlockSpec((LAYERS_NUM, B, H), lambda i: (0, 0, 0)),      # h0
            pl.BlockSpec((LAYERS_NUM, B, H), lambda i: (0, 0, 0)),      # c0
            pl.BlockSpec((D, 4 * H), lambda i: (0, 0)),                 # W_ih0^T
            pl.BlockSpec((H, 4 * H), lambda i: (0, 0)),                 # W_hh0^T
            pl.BlockSpec((1, 4 * H), lambda i: (0, 0)),                 # bias0
            pl.BlockSpec((H, 4 * H), lambda i: (0, 0)),                 # W_ih1^T
            pl.BlockSpec((H, 4 * H), lambda i: (0, 0)),                 # W_hh1^T
            pl.BlockSpec((1, 4 * H), lambda i: (0, 0)),                 # bias1
            pl.BlockSpec((H, 2 * O), lambda i: (0, 0)),                 # W_heads^T
            pl.BlockSpec((1, 2 * O), lambda i: (0, 0)),                 # b_heads
        ],
        out_specs=[
            pl.BlockSpec((S * B, 2 * O), lambda i: (0, 0)),
            pl.BlockSpec((LAYERS_NUM, B, H), lambda i: (0, 0, 0)),
            pl.BlockSpec((LAYERS_NUM, B, H), lambda i: (0, 0, 0)),
        ],
        scratch_shapes=[
            pltpu.VMEM((S * B, H), jnp.float32),    # layer-0 outputs
            pltpu.VMEM((S * B, H), jnp.float32),    # layer-1 outputs (cell_out)
        ],
    )
    packed, h_, c_ = pl.pallas_call(
        _policy_kernel,
        out_shape=out_shapes,
        grid_spec=grid_spec,
        compiler_params=pltpu.CompilerParams(
            dimension_semantics=("arbitrary",)),
    )(x_flat, h, c,
      p0["w_ih_t"], p0["w_hh_t"], p0["bias"],
      p1["w_ih_t"], p1["w_hh_t"], p1["bias"],
      whd, bhd)

    packed = packed.reshape(S, B, 2 * O)
    mu = packed[..., :O]
    sigma = packed[..., O:]
    return mu, sigma, h_, c_


# -----------------------------------------------------------------------------
# Deterministic parameter init (PyTorch-style uniform(-1/sqrt(H), 1/sqrt(H)))
# -----------------------------------------------------------------------------
def init_params(key):
    bound = 1.0 / jnp.sqrt(jnp.float32(CELL_SIZE))
    params = {"lstm": []}
    for l in range(LAYERS_NUM):
        d_in = POP_SIZE if l == 0 else CELL_SIZE
        key, k1, k2, k3, k4 = jax.random.split(key, 5)
        w_ih = jax.random.uniform(k1, (4 * CELL_SIZE, d_in), jnp.float32,
                                  -bound, bound)
        w_hh = jax.random.uniform(k2, (4 * CELL_SIZE, CELL_SIZE), jnp.float32,
                                  -bound, bound)
        b_ih = jax.random.uniform(k3, (4 * CELL_SIZE,), jnp.float32,
                                  -bound, bound)
        b_hh = jax.random.uniform(k4, (4 * CELL_SIZE,), jnp.float32,
                                  -bound, bound)
        params["lstm"].append({
            "w_ih_t": w_ih.T,                              # (d_in, 4H)
            "w_hh_t": w_hh.T,                              # (H, 4H)
            "bias": (b_ih + b_hh).reshape(1, 4 * CELL_SIZE),
        })
    for name in ("mu", "sigma"):
        key, k1, k2 = jax.random.split(key, 3)
        w = jax.random.uniform(k1, (OUT_SIZE, CELL_SIZE), jnp.float32,
                               -bound, bound)
        b = jax.random.uniform(k2, (OUT_SIZE,), jnp.float32, -bound, bound)
        params[name] = {"w_t": w.T, "b": b.reshape(1, OUT_SIZE)}
    return params


# -----------------------------------------------------------------------------
# Pure-JAX reference (correctness sanity check)
# -----------------------------------------------------------------------------
def reference_forward(params, x, h, c):
    layer_in = x
    h_fin, c_fin = [], []
    for l in range(LAYERS_NUM):
        p = params["lstm"][l]
        hh, cc = h[l], c[l]
        ys = []
        for t in range(x.shape[0]):
            gates = layer_in[t] @ p["w_ih_t"] + hh @ p["w_hh_t"] + p["bias"]
            H = CELL_SIZE
            i = jax.nn.sigmoid(gates[:, 0 * H:1 * H])
            f = jax.nn.sigmoid(gates[:, 1 * H:2 * H])
            g = jnp.tanh(gates[:, 2 * H:3 * H])
            o = jax.nn.sigmoid(gates[:, 3 * H:4 * H])
            cc = f * cc + i * g
            hh = o * jnp.tanh(cc)
            ys.append(hh)
        layer_in = jnp.stack(ys, axis=0)
        h_fin.append(hh)
        c_fin.append(cc)
    mu = layer_in @ params["mu"]["w_t"] + params["mu"]["b"]
    sg = jax.nn.sigmoid(layer_in @ params["sigma"]["w_t"] + params["sigma"]["b"])
    return mu, sg, jnp.stack(h_fin, 0), jnp.stack(c_fin, 0)


if __name__ == "__main__":
    key = jax.random.PRNGKey(0)
    key, kp, kx, kh, kc = jax.random.split(key, 5)

    params = init_params(kp)
    x = jax.random.normal(kx, (SEQ, BATCH, POP_SIZE), jnp.float32)
    h0 = jax.random.normal(kh, (LAYERS_NUM, BATCH, CELL_SIZE), jnp.float32)
    c0 = jax.random.normal(kc, (LAYERS_NUM, BATCH, CELL_SIZE), jnp.float32)

    mu, sigma, h_, c_ = policy_net_forward(params, x, h0, c0)
    jax.block_until_ready((mu, sigma, h_, c_))

    mu_r, sg_r, h_r, c_r = reference_forward(params, x, h0, c0)
    assert jnp.allclose(mu, mu_r, atol=1e-4), "mu mismatch"
    assert jnp.allclose(sigma, sg_r, atol=1e-4), "sigma mismatch"
    assert jnp.allclose(h_, h_r, atol=1e-4), "h mismatch"
    assert jnp.allclose(c_, c_r, atol=1e-4), "c mismatch"

    print("KERNEL_OK")
</pallas_src>

<mosaic_0001>
module attributes {stable_mosaic.version = 11 : i64} {
  func.func @_policy_kernel(%arg0: i32, %arg1: memref<16x16xf32, #tpu.memory_space<vmem>>, %arg2: memref<2x2x32xf32, #tpu.memory_space<vmem>>, %arg3: memref<2x2x32xf32, #tpu.memory_space<vmem>>, %arg4: memref<16x128xf32, #tpu.memory_space<vmem>>, %arg5: memref<32x128xf32, #tpu.memory_space<vmem>>, %arg6: memref<1x128xf32, #tpu.memory_space<vmem>>, %arg7: memref<32x128xf32, #tpu.memory_space<vmem>>, %arg8: memref<32x128xf32, #tpu.memory_space<vmem>>, %arg9: memref<1x128xf32, #tpu.memory_space<vmem>>, %arg10: memref<32x60xf32, #tpu.memory_space<vmem>>, %arg11: memref<1x60xf32, #tpu.memory_space<vmem>>, %arg12: memref<16x60xf32, #tpu.memory_space<vmem>>, %arg13: memref<2x2x32xf32, #tpu.memory_space<vmem>>, %arg14: memref<2x2x32xf32, #tpu.memory_space<vmem>>, %arg15: memref<16x32xf32, #tpu.memory_space<vmem>>, %arg16: memref<16x32xf32, #tpu.memory_space<vmem>>) attributes {dimension_semantics = [#tpu.dimension_semantics<arbitrary>], iteration_bounds = array<i64: 1>, scalar_prefetch = 0 : i64, scratch_operands = 2 : i64, tpu.core_type = #tpu.core_type<tc>, window_params = [{pipeline_mode = #tpu.pipeline_mode<synchronous>, transform_indices = @transform_0, window_bounds = array<i64: 16, 16>}, {pipeline_mode = #tpu.pipeline_mode<synchronous>, transform_indices = @transform_1, window_bounds = array<i64: 2, 2, 32>}, {pipeline_mode = #tpu.pipeline_mode<synchronous>, transform_indices = @transform_2, window_bounds = array<i64: 2, 2, 32>}, {pipeline_mode = #tpu.pipeline_mode<synchronous>, transform_indices = @transform_3, window_bounds = array<i64: 16, 128>}, {pipeline_mode = #tpu.pipeline_mode<synchronous>, transform_indices = @transform_4, window_bounds = array<i64: 32, 128>}, {pipeline_mode = #tpu.pipeline_mode<synchronous>, transform_indices = @transform_5, window_bounds = array<i64: 1, 128>}, {pipeline_mode = #tpu.pipeline_mode<synchronous>, transform_indices = @transform_6, window_bounds = array<i64: 32, 128>}, {pipeline_mode = #tpu.pipeline_mode<synchronous>, transform_indices = @transform_7, window_bounds = array<i64: 32, 128>}, {pipeline_mode = #tpu.pipeline_mode<synchronous>, transform_indices = @transform_8, window_bounds = array<i64: 1, 128>}, {pipeline_mode = #tpu.pipeline_mode<synchronous>, transform_indices = @transform_9, window_bounds = array<i64: 32, 60>}, {pipeline_mode = #tpu.pipeline_mode<synchronous>, transform_indices = @transform_10, window_bounds = array<i64: 1, 60>}, {pipeline_mode = #tpu.pipeline_mode<synchronous>, transform_indices = @transform_11, window_bounds = array<i64: 16, 60>}, {pipeline_mode = #tpu.pipeline_mode<synchronous>, transform_indices = @transform_12, window_bounds = array<i64: 2, 2, 32>}, {pipeline_mode = #tpu.pipeline_mode<synchronous>, transform_indices = @transform_13, window_bounds = array<i64: 2, 2, 32>}]} {
    %c0 = arith.constant 0 : index
    %c0_0 = arith.constant 0 : index
    %0 = vector.load %arg5[%c0, %c0_0] : memref<32x128xf32, #tpu.memory_space<vmem>>, vector<32x128xf32>
    %c0_1 = arith.constant 0 : index
    %c0_2 = arith.constant 0 : index
    %1 = vector.load %arg8[%c0_1, %c0_2] : memref<32x128xf32, #tpu.memory_space<vmem>>, vector<32x128xf32>
    %c0_3 = arith.constant 0 : index
    %c0_4 = arith.constant 0 : index
    %2 = vector.load %arg1[%c0_3, %c0_4] : memref<16x16xf32, #tpu.memory_space<vmem>>, vector<16x16xf32>
    %c0_5 = arith.constant 0 : index
    %c0_6 = arith.constant 0 : index
    %3 = vector.load %arg4[%c0_5, %c0_6] : memref<16x128xf32, #tpu.memory_space<vmem>>, vector<16x128xf32>
    %cst = arith.constant dense<0.000000e+00> : vector<16x128xf32>
    %4 = tpu.matmul %2, %3, %cst {dimension_numbers = #tpu.dot_dimension_numbers<[1], [0], [0], [1], [0, 0, 1, 1], [], []>} : vector<16x16xf32>, vector<16x128xf32>, vector<16x128xf32> -> vector<16x128xf32>
    %c0_7 = arith.constant 0 : index
    %c0_8 = arith.constant 0 : index
    %5 = vector.load %arg6[%c0_7, %c0_8] : memref<1x128xf32, #tpu.memory_space<vmem>>, vector<1x128xf32>
    %6 = vector.broadcast %5 : vector<1x128xf32> to vector<16x128xf32>
    %7 = arith.addf %4, %6 : vector<16x128xf32>
    %c0_9 = arith.constant 0 : index
    %c0_10 = arith.constant 0 : index
    %c0_11 = arith.constant 0 : index
    %8 = vector.load %arg2[%c0_9, %c0_10, %c0_11] : memref<2x2x32xf32, #tpu.memory_space<vmem>>, vector<1x2x32xf32>
    %9 = vector.shape_cast %8 : vector<1x2x32xf32> to vector<2x32xf32>
    %c0_12 = arith.constant 0 : index
    %c0_13 = arith.constant 0 : index
    %c0_14 = arith.constant 0 : index
    %10 = vector.load %arg3[%c0_12, %c0_13, %c0_14] : memref<2x2x32xf32, #tpu.memory_space<vmem>>, vector<1x2x32xf32>
    %11 = vector.shape_cast %10 : vector<1x2x32xf32> to vector<2x32xf32>
    %12 = vector.extract_strided_slice %7 {offsets = [0, 0], sizes = [2, 128], strides = [1, 1]} : vector<16x128xf32> to vector<2x128xf32>
    %cst_15 = arith.constant dense<0.000000e+00> : vector<2x128xf32>
    %13 = tpu.matmul %9, %0, %cst_15 {dimension_numbers = #tpu.dot_dimension_numbers<[1], [0], [0], [1], [0, 0, 1, 1], [], []>} : vector<2x32xf32>, vector<32x128xf32>, vector<2x128xf32> -> vector<2x128xf32>
    %14 = arith.addf %12, %13 : vector<2x128xf32>
    %15 = arith.negf %14 : vector<2x128xf32>
    %16 = math.exp %15 : vector<2x128xf32>
    %cst_16 = arith.constant 1.000000e+00 : f32
    %17 = vector.broadcast %cst_16 : f32 to vector<2x128xf32>
    %18 = arith.addf %17, %16 : vector<2x128xf32>
    %19 = arith.divf %17, %18 : vector<2x128xf32>
    %20 = math.tanh %14 : vector<2x128xf32>
    %21 = vector.extract_strided_slice %19 {offsets = [0, 32], sizes = [2, 32], strides = [1, 1]} : vector<2x128xf32> to vector<2x32xf32>
    %22 = arith.mulf %21, %11 : vector<2x32xf32>
    %23 = vector.extract_strided_slice %19 {offsets = [0, 0], sizes = [2, 32], strides = [1, 1]} : vector<2x128xf32> to vector<2x32xf32>
    %24 = vector.extract_strided_slice %20 {offsets = [0, 64], sizes = [2, 32], strides = [1, 1]} : vector<2x128xf32> to vector<2x32xf32>
    %25 = arith.mulf %23, %24 : vector<2x32xf32>
    %26 = arith.addf %22, %25 : vector<2x32xf32>
    %27 = vector.extract_strided_slice %19 {offsets = [0, 96], sizes = [2, 32], strides = [1, 1]} : vector<2x128xf32> to vector<2x32xf32>
    %28 = math.tanh %26 : vector<2x32xf32>
    %29 = arith.mulf %27, %28 : vector<2x32xf32>
    %c0_17 = arith.constant 0 : index
    %c0_18 = arith.constant 0 : index
    %30 = vector.load %arg15[%c0_17, %c0_18] : memref<16x32xf32, #tpu.memory_space<vmem>>, vector<2x32xf32>
    tpu.vector_store %arg15[%c0_17, %c0_18], %29 {strides = array<i32>} : memref<16x32xf32, #tpu.memory_space<vmem>>, vector<2x32xf32>,
    %31 = vector.extract_strided_slice %7 {offsets = [2, 0], sizes = [2, 128], strides = [1, 1]} : vector<16x128xf32> to vector<2x128xf32>
    %cst_19 = arith.constant dense<0.000000e+00> : vector<2x128xf32>
    %32 = tpu.matmul %29, %0, %cst_19 {dimension_numbers = #tpu.dot_dimension_numbers<[1], [0], [0], [1], [0, 0, 1, 1], [], []>} : vector<2x32xf32>, vector<32x128xf32>, vector<2x128xf32> -> vector<2x128xf32>
    %33 = arith.addf %31, %32 : vector<2x128xf32>
    %34 = arith.negf %33 : vector<2x128xf32>
    %35 = math.exp %34 : vector<2x128xf32>
    %cst_20 = arith.constant 1.000000e+00 : f32
    %36 = vector.broadcast %cst_20 : f32 to vector<2x128xf32>
    %37 = arith.addf %36, %35 : vector<2x128xf32>
    %38 = arith.divf %36, %37 : vector<2x128xf32>
    %39 = math.tanh %33 : vector<2x128xf32>
    %40 = vector.extract_strided_slice %38 {offsets = [0, 32], sizes = [2, 32], strides = [1, 1]} : vector<2x128xf32> to vector<2x32xf32>
    %41 = arith.mulf %40, %26 : vector<2x32xf32>
    %42 = vector.extract_strided_slice %38 {offsets = [0, 0], sizes = [2, 32], strides = [1, 1]} : vector<2x128xf32> to vector<2x32xf32>
    %43 = vector.extract_strided_slice %39 {offsets = [0, 64], sizes = [2, 32], strides = [1, 1]} : vector<2x128xf32> to vector<2x32xf32>
    %44 = arith.mulf %42, %43 : vector<2x32xf32>
    %45 = arith.addf %41, %44 : vector<2x32xf32>
    %46 = vector.extract_strided_slice %38 {offsets = [0, 96], sizes = [2, 32], strides = [1, 1]} : vector<2x128xf32> to vector<2x32xf32>
    %47 = math.tanh %45 : vector<2x32xf32>
    %48 = arith.mulf %46, %47 : vector<2x32xf32>
    %c2 = arith.constant 2 : index
    %c0_21 = arith.constant 0 : index
    %49 = vector.load %arg15[%c2, %c0_21] : memref<16x32xf32, #tpu.memory_space<vmem>>, vector<2x32xf32>
    tpu.vector_store %arg15[%c2, %c0_21], %48 {strides = array<i32>} : memref<16x32xf32, #tpu.memory_space<vmem>>, vector<2x32xf32>,
    %50 = vector.extract_strided_slice %7 {offsets = [4, 0], sizes = [2, 128], strides = [1, 1]} : vector<16x128xf32> to vector<2x128xf32>
    %cst_22 = arith.constant dense<0.000000e+00> : vector<2x128xf32>
    %51 = tpu.matmul %48, %0, %cst_22 {dimension_numbers = #tpu.dot_dimension_numbers<[1], [0], [0], [1], [0, 0, 1, 1], [], []>} : vector<2x32xf32>, vector<32x128xf32>, vector<2x128xf32> -> vector<2x128xf32>
    %52 = arith.addf %50, %51 : vector<2x128xf32>
    %53 = arith.negf %52 : vector<2x128xf32>
    %54 = math.exp %53 : vector<2x128xf32>
    %cst_23 = arith.constant 1.000000e+00 : f32
    %55 = vector.broadcast %cst_23 : f32 to vector<2x128xf32>
    %56 = arith.addf %55, %54 : vector<2x128xf32>
    %57 = arith.divf %55, %56 : vector<2x128xf32>
    %58 = math.tanh %52 : vector<2x128xf32>
    %59 = vector.extract_strided_slice %57 {offsets = [0, 32], sizes = [2, 32], strides = [1, 1]} : vector<2x128xf32> to vector<2x32xf32>
    %60 = arith.mulf %59, %45 : vector<2x32xf32>
    %61 = vector.extract_strided_slice %57 {offsets = [0, 0], sizes = [2, 32], strides = [1, 1]} : vector<2x128xf32> to vector<2x32xf32>
    %62 = vector.extract_strided_slice %58 {offsets = [0, 64], sizes = [2, 32], strides = [1, 1]} : vector<2x128xf32> to vector<2x32xf32>
    %63 = arith.mulf %61, %62 : vector<2x32xf32>
    %64 = arith.addf %60, %63 : vector<2x32xf32>
    %65 = vector.extract_strided_slice %57 {offsets = [0, 96], sizes = [2, 32], strides = [1, 1]} : vector<2x128xf32> to vector<2x32xf32>
    %66 = math.tanh %64 : vector<2x32xf32>
    %67 = arith.mulf %65, %66 : vector<2x32xf32>
    %c4 = arith.constant 4 : index
    %c0_24 = arith.constant 0 : index
    %68 = vector.load %arg15[%c4, %c0_24] : memref<16x32xf32, #tpu.memory_space<vmem>>, vector<2x32xf32>
    tpu.vector_store %arg15[%c4, %c0_24], %67 {strides = array<i32>} : memref<16x32xf32, #tpu.memory_space<vmem>>, vector<2x32xf32>,
    %69 = vector.extract_strided_slice %7 {offsets = [6, 0], sizes = [2, 128], strides = [1, 1]} : vector<16x128xf32> to vector<2x128xf32>
    %cst_25 = arith.constant dense<0.000000e+00> : vector<2x128xf32>
    %70 = tpu.matmul %67, %0, %cst_25 {dimension_numbers = #tpu.dot_dimension_numbers<[1], [0], [0], [1], [0, 0, 1, 1], [], []>} : vector<2x32xf32>, vector<32x128xf32>, vector<2x128xf32> -> vector<2x128xf32>
    %71 = arith.addf %69, %70 : vector<2x128xf32>
    %72 = arith.negf %71 : vector<2x128xf32>
    %73 = math.exp %72 : vector<2x128xf32>
    %cst_26 = arith.constant 1.000000e+00 : f32
    %74 = vector.broadcast %cst_26 : f32 to vector<2x128xf32>
    %75 = arith.addf %74, %73 : vector<2x128xf32>
    %76 = arith.divf %74, %75 : vector<2x128xf32>
    %77 = math.tanh %71 : vector<2x128xf32>
    %78 = vector.extract_strided_slice %76 {offsets = [0, 32], sizes = [2, 32], strides = [1, 1]} : vector<2x128xf32> to vector<2x32xf32>
    %79 = arith.mulf %78, %64 : vector<2x32xf32>
    %80 = vector.extract_strided_slice %76 {offsets = [0, 0], sizes = [2, 32], strides = [1, 1]} : vector<2x128xf32> to vector<2x32xf32>
    %81 = vector.extract_strided_slice %77 {offsets = [0, 64], sizes = [2, 32], strides = [1, 1]} : vector<2x128xf32> to vector<2x32xf32>
    %82 = arith.mulf %80, %81 : vector<2x32xf32>
    %83 = arith.addf %79, %82 : vector<2x32xf32>
    %84 = vector.extract_strided_slice %76 {offsets = [0, 96], sizes = [2, 32], strides = [1, 1]} : vector<2x128xf32> to vector<2x32xf32>
    %85 = math.tanh %83 : vector<2x32xf32>
    %86 = arith.mulf %84, %85 : vector<2x32xf32>
    %c6 = arith.constant 6 : index
    %c0_27 = arith.constant 0 : index
    %87 = vector.load %arg15[%c6, %c0_27] : memref<16x32xf32, #tpu.memory_space<vmem>>, vector<2x32xf32>
    tpu.vector_store %arg15[%c6, %c0_27], %86 {strides = array<i32>} : memref<16x32xf32, #tpu.memory_space<vmem>>, vector<2x32xf32>,
    %88 = vector.extract_strided_slice %7 {offsets = [8, 0], sizes = [2, 128], strides = [1, 1]} : vector<16x128xf32> to vector<2x128xf32>
    %cst_28 = arith.constant dense<0.000000e+00> : vector<2x128xf32>
    %89 = tpu.matmul %86, %0, %cst_28 {dimension_numbers = #tpu.dot_dimension_numbers<[1], [0], [0], [1], [0, 0, 1, 1], [], []>} : vector<2x32xf32>, vector<32x128xf32>, vector<2x128xf32> -> vector<2x128xf32>
    %90 = arith.addf %88, %89 : vector<2x128xf32>
    %91 = arith.negf %90 : vector<2x128xf32>
    %92 = math.exp %91 : vector<2x128xf32>
    %cst_29 = arith.constant 1.000000e+00 : f32
    %93 = vector.broadcast %cst_29 : f32 to vector<2x128xf32>
    %94 = arith.addf %93, %92 : vector<2x128xf32>
    %95 = arith.divf %93, %94 : vector<2x128xf32>
    %96 = math.tanh %90 : vector<2x128xf32>
    %97 = vector.extract_strided_slice %95 {offsets = [0, 32], sizes = [2, 32], strides = [1, 1]} : vector<2x128xf32> to vector<2x32xf32>
    %98 = arith.mulf %97, %83 : vector<2x32xf32>
    %99 = vector.extract_strided_slice %95 {offsets = [0, 0], sizes = [2, 32], strides = [1, 1]} : vector<2x128xf32> to vector<2x32xf32>
    %100 = vector.extract_strided_slice %96 {offsets = [0, 64], sizes = [2, 32], strides = [1, 1]} : vector<2x128xf32> to vector<2x32xf32>
    %101 = arith.mulf %99, %100 : vector<2x32xf32>
    %102 = arith.addf %98, %101 : vector<2x32xf32>
    %103 = vector.extract_strided_slice %95 {offsets = [0, 96], sizes = [2, 32], strides = [1, 1]} : vector<2x128xf32> to vector<2x32xf32>
    %104 = math.tanh %102 : vector<2x32xf32>
    %105 = arith.mulf %103, %104 : vector<2x32xf32>
    %c8 = arith.constant 8 : index
    %c0_30 = arith.constant 0 : index
    %106 = vector.load %arg15[%c8, %c0_30] : memref<16x32xf32, #tpu.memory_space<vmem>>, vector<2x32xf32>
    tpu.vector_store %arg15[%c8, %c0_30], %105 {strides = array<i32>} : memref<16x32xf32, #tpu.memory_space<vmem>>, vector<2x32xf32>,
    %107 = vector.extract_strided_slice %7 {offsets = [10, 0], sizes = [2, 128], strides = [1, 1]} : vector<16x128xf32> to vector<2x128xf32>
    %cst_31 = arith.constant dense<0.000000e+00> : vector<2x128xf32>
    %108 = tpu.matmul %105, %0, %cst_31 {dimension_numbers = #tpu.dot_dimension_numbers<[1], [0], [0], [1], [0, 0, 1, 1], [], []>} : vector<2x32xf32>, vector<32x128xf32>, vector<2x128xf32> -> vector<2x128xf32>
    %109 = arith.addf %107, %108 : vector<2x128xf32>
    %110 = arith.negf %109 : vector<2x128xf32>
    %111 = math.exp %110 : vector<2x128xf32>
    %cst_32 = arith.constant 1.000000e+00 : f32
    %112 = vector.broadcast %cst_32 : f32 to vector<2x128xf32>
    %113 = arith.addf %112, %111 : vector<2x128xf32>
    %114 = arith.divf %112, %113 : vector<2x128xf32>
    %115 = math.tanh %109 : vector<2x128xf32>
    %116 = vector.extract_strided_slice %114 {offsets = [0, 32], sizes = [2, 32], strides = [1, 1]} : vector<2x128xf32> to vector<2x32xf32>
    %117 = arith.mulf %116, %102 : vector<2x32xf32>
    %118 = vector.extract_strided_slice %114 {offsets = [0, 0], sizes = [2, 32], strides = [1, 1]} : vector<2x128xf32> to vector<2x32xf32>
    %119 = vector.extract_strided_slice %115 {offsets = [0, 64], sizes = [2, 32], strides = [1, 1]} : vector<2x128xf32> to vector<2x32xf32>
    %120 = arith.mulf %118, %119 : vector<2x32xf32>
    %121 = arith.addf %117, %120 : vector<2x32xf32>
    %122 = vector.extract_strided_slice %114 {offsets = [0, 96], sizes = [2, 32], strides = [1, 1]} : vector<2x128xf32> to vector<2x32xf32>
    %123 = math.tanh %121 : vector<2x32xf32>
    %124 = arith.mulf %122, %123 : vector<2x32xf32>
    %c10 = arith.constant 10 : index
    %c0_33 = arith.constant 0 : index
    %125 = vector.load %arg15[%c10, %c0_33] : memref<16x32xf32, #tpu.memory_space<vmem>>, vector<2x32xf32>
    tpu.vector_store %arg15[%c10, %c0_33], %124 {strides = array<i32>} : memref<16x32xf32, #tpu.memory_space<vmem>>, vector<2x32xf32>,
    %126 = vector.extract_strided_slice %7 {offsets = [12, 0], sizes = [2, 128], strides = [1, 1]} : vector<16x128xf32> to vector<2x128xf32>
    %cst_34 = arith.constant dense<0.000000e+00> : vector<2x128xf32>
    %127 = tpu.matmul %124, %0, %cst_34 {dimension_numbers = #tpu.dot_dimension_numbers<[1], [0], [0], [1], [0, 0, 1, 1], [], []>} : vector<2x32xf32>, vector<32x128xf32>, vector<2x128xf32> -> vector<2x128xf32>
    %128 = arith.addf %126, %127 : vector<2x128xf32>
    %129 = arith.negf %128 : vector<2x128xf32>
    %130 = math.exp %129 : vector<2x128xf32>
    %cst_35 = arith.constant 1.000000e+00 : f32
    %131 = vector.broadcast %cst_35 : f32 to vector<2x128xf32>
    %132 = arith.addf %131, %130 : vector<2x128xf32>
    %133 = arith.divf %131, %132 : vector<2x128xf32>
    %134 = math.tanh %128 : vector<2x128xf32>
    %135 = vector.extract_strided_slice %133 {offsets = [0, 32], sizes = [2, 32], strides = [1, 1]} : vector<2x128xf32> to vector<2x32xf32>
    %136 = arith.mulf %135, %121 : vector<2x32xf32>
    %137 = vector.extract_strided_slice %133 {offsets = [0, 0], sizes = [2, 32], strides = [1, 1]} : vector<2x128xf32> to vector<2x32xf32>
    %138 = vector.extract_strided_slice %134 {offsets = [0, 64], sizes = [2, 32], strides = [1, 1]} : vector<2x128xf32> to vector<2x32xf32>
    %139 = arith.mulf %137, %138 : vector<2x32xf32>
    %140 = arith.addf %136, %139 : vector<2x32xf32>
    %141 = vector.extract_strided_slice %133 {offsets = [0, 96], sizes = [2, 32], strides = [1, 1]} : vector<2x128xf32> to vector<2x32xf32>
    %142 = math.tanh %140 : vector<2x32xf32>
    %143 = arith.mulf %141, %142 : vector<2x32xf32>
    %c12 = arith.constant 12 : index
    %c0_36 = arith.constant 0 : index
    %144 = vector.load %arg15[%c12, %c0_36] : memref<16x32xf32, #tpu.memory_space<vmem>>, vector<2x32xf32>
    tpu.vector_store %arg15[%c12, %c0_36], %143 {strides = array<i32>} : memref<16x32xf32, #tpu.memory_space<vmem>>, vector<2x32xf32>,
    %145 = vector.extract_strided_slice %7 {offsets = [14, 0], sizes = [2, 128], strides = [1, 1]} : vector<16x128xf32> to vector<2x128xf32>
    %cst_37 = arith.constant dense<0.000000e+00> : vector<2x128xf32>
    %146 = tpu.matmul %143, %0, %cst_37 {dimension_numbers = #tpu.dot_dimension_numbers<[1], [0], [0], [1], [0, 0, 1, 1], [], []>} : vector<2x32xf32>, vector<32x128xf32>, vector<2x128xf32> -> vector<2x128xf32>
    %147 = arith.addf %145, %146 : vector<2x128xf32>
    %148 = arith.negf %147 : vector<2x128xf32>
    %149 = math.exp %148 : vector<2x128xf32>
    %cst_38 = arith.constant 1.000000e+00 : f32
    %150 = vector.broadcast %cst_38 : f32 to vector<2x128xf32>
    %151 = arith.addf %150, %149 : vector<2x128xf32>
    %152 = arith.divf %150, %151 : vector<2x128xf32>
    %153 = math.tanh %147 : vector<2x128xf32>
    %154 = vector.extract_strided_slice %152 {offsets = [0, 32], sizes = [2, 32], strides = [1, 1]} : vector<2x128xf32> to vector<2x32xf32>
    %155 = arith.mulf %154, %140 : vector<2x32xf32>
    %156 = vector.extract_strided_slice %152 {offsets = [0, 0], sizes = [2, 32], strides = [1, 1]} : vector<2x128xf32> to vector<2x32xf32>
    %157 = vector.extract_strided_slice %153 {offsets = [0, 64], sizes = [2, 32], strides = [1, 1]} : vector<2x128xf32> to vector<2x32xf32>
    %158 = arith.mulf %156, %157 : vector<2x32xf32>
    %159 = arith.addf %155, %158 : vector<2x32xf32>
    %160 = vector.extract_strided_slice %152 {offsets = [0, 96], sizes = [2, 32], strides = [1, 1]} : vector<2x128xf32> to vector<2x32xf32>
    %161 = math.tanh %159 : vector<2x32xf32>
    %162 = arith.mulf %160, %161 : vector<2x32xf32>
    %c14 = arith.constant 14 : index
    %c0_39 = arith.constant 0 : index
    %163 = vector.load %arg15[%c14, %c0_39] : memref<16x32xf32, #tpu.memory_space<vmem>>, vector<2x32xf32>
    tpu.vector_store %arg15[%c14, %c0_39], %162 {strides = array<i32>} : memref<16x32xf32, #tpu.memory_space<vmem>>, vector<2x32xf32>,
    %c0_40 = arith.constant 0 : index
    %c0_41 = arith.constant 0 : index
    %164 = vector.load %arg15[%c0_40, %c0_41] : memref<16x32xf32, #tpu.memory_space<vmem>>, vector<16x32xf32>
    %c0_42 = arith.constant 0 : index
    %c0_43 = arith.constant 0 : index
    %165 = vector.load %arg7[%c0_42, %c0_43] : memref<32x128xf32, #tpu.memory_space<vmem>>, vector<32x128xf32>
    %cst_44 = arith.constant dense<0.000000e+00> : vector<16x128xf32>
    %166 = tpu.matmul %164, %165, %cst_44 {dimension_numbers = #tpu.dot_dimension_numbers<[1], [0], [0], [1], [0, 0, 1, 1], [], []>} : vector<16x32xf32>, vector<32x128xf32>, vector<16x128xf32> -> vector<16x128xf32>
    %c0_45 = arith.constant 0 : index
    %c0_46 = arith.constant 0 : index
    %167 = vector.load %arg9[%c0_45, %c0_46] : memref<1x128xf32, #tpu.memory_space<vmem>>, vector<1x128xf32>
    %168 = vector.broadcast %167 : vector<1x128xf32> to vector<16x128xf32>
    %169 = arith.addf %166, %168 : vector<16x128xf32>
    %c1 = arith.constant 1 : index
    %c0_47 = arith.constant 0 : index
    %c0_48 = arith.constant 0 : index
    %170 = vector.load %arg2[%c1, %c0_47, %c0_48] : memref<2x2x32xf32, #tpu.memory_space<vmem>>, vector<1x2x32xf32>
    %171 = vector.shape_cast %170 : vector<1x2x32xf32> to vector<2x32xf32>
    %c1_49 = arith.constant 1 : index
    %c0_50 = arith.constant 0 : index
    %c0_51 = arith.constant 0 : index
    %172 = vector.load %arg3[%c1_49, %c0_50, %c0_51] : memref<2x2x32xf32, #tpu.memory_space<vmem>>, vector<1x2x32xf32>
    %173 = vector.shape_cast %172 : vector<1x2x32xf32> to vector<2x32xf32>
    %174 = vector.extract_strided_slice %169 {offsets = [0, 0], sizes = [2, 128], strides = [1, 1]} : vector<16x128xf32> to vector<2x128xf32>
    %cst_52 = arith.constant dense<0.000000e+00> : vector<2x128xf32>
    %175 = tpu.matmul %171, %1, %cst_52 {dimension_numbers = #tpu.dot_dimension_numbers<[1], [0], [0], [1], [0, 0, 1, 1], [], []>} : vector<2x32xf32>, vector<32x128xf32>, vector<2x128xf32> -> vector<2x128xf32>
    %176 = arith.addf %174, %175 : vector<2x128xf32>
    %177 = arith.negf %176 : vector<2x128xf32>
    %178 = math.exp %177 : vector<2x128xf32>
    %cst_53 = arith.constant 1.000000e+00 : f32
    %179 = vector.broadcast %cst_53 : f32 to vector<2x128xf32>
    %180 = arith.addf %179, %178 : vector<2x128xf32>
    %181 = arith.divf %179, %180 : vector<2x128xf32>
    %182 = math.tanh %176 : vector<2x128xf32>
    %183 = vector.extract_strided_slice %181 {offsets = [0, 32], sizes = [2, 32], strides = [1, 1]} : vector<2x128xf32> to vector<2x32xf32>
    %184 = arith.mulf %183, %173 : vector<2x32xf32>
    %185 = vector.extract_strided_slice %181 {offsets = [0, 0], sizes = [2, 32], strides = [1, 1]} : vector<2x128xf32> to vector<2x32xf32>
    %186 = vector.extract_strided_slice %182 {offsets = [0, 64], sizes = [2, 32], strides = [1, 1]} : vector<2x128xf32> to vector<2x32xf32>
    %187 = arith.mulf %185, %186 : vector<2x32xf32>
    %188 = arith.addf %184, %187 : vector<2x32xf32>
    %189 = vector.extract_strided_slice %181 {offsets = [0, 96], sizes = [2, 32], strides = [1, 1]} : vector<2x128xf32> to vector<2x32xf32>
    %190 = math.tanh %188 : vector<2x32xf32>
    %191 = arith.mulf %189, %190 : vector<2x32xf32>
    %c0_54 = arith.constant 0 : index
    %c0_55 = arith.constant 0 : index
    %192 = vector.load %arg16[%c0_54, %c0_55] : memref<16x32xf32, #tpu.memory_space<vmem>>, vector<2x32xf32>
    tpu.vector_store %arg16[%c0_54, %c0_55], %191 {strides = array<i32>} : memref<16x32xf32, #tpu.memory_space<vmem>>, vector<2x32xf32>,
    %193 = vector.extract_strided_slice %169 {offsets = [2, 0], sizes = [2, 128], strides = [1, 1]} : vector<16x128xf32> to vector<2x128xf32>
    %cst_56 = arith.constant dense<0.000000e+00> : vector<2x128xf32>
    %194 = tpu.matmul %191, %1, %cst_56 {dimension_numbers = #tpu.dot_dimension_numbers<[1], [0], [0], [1], [0, 0, 1, 1], [], []>} : vector<2x32xf32>, vector<32x128xf32>, vector<2x128xf32> -> vector<2x128xf32>
    %195 = arith.addf %193, %194 : vector<2x128xf32>
    %196 = arith.negf %195 : vector<2x128xf32>
    %197 = math.exp %196 : vector<2x128xf32>
    %cst_57 = arith.constant 1.000000e+00 : f32
    %198 = vector.broadcast %cst_57 : f32 to vector<2x128xf32>
    %199 = arith.addf %198, %197 : vector<2x128xf32>
    %200 = arith.divf %198, %199 : vector<2x128xf32>
    %201 = math.tanh %195 : vector<2x128xf32>
    %202 = vector.extract_strided_slice %200 {offsets = [0, 32], sizes = [2, 32], strides = [1, 1]} : vector<2x128xf32> to vector<2x32xf32>
    %203 = arith.mulf %202, %188 : vector<2x32xf32>
    %204 = vector.extract_strided_slice %200 {offsets = [0, 0], sizes = [2, 32], strides = [1, 1]} : vector<2x128xf32> to vector<2x32xf32>
    %205 = vector.extract_strided_slice %201 {offsets = [0, 64], sizes = [2, 32], strides = [1, 1]} : vector<2x128xf32> to vector<2x32xf32>
    %206 = arith.mulf %204, %205 : vector<2x32xf32>
    %207 = arith.addf %203, %206 : vector<2x32xf32>
    %208 = vector.extract_strided_slice %200 {offsets = [0, 96], sizes = [2, 32], strides = [1, 1]} : vector<2x128xf32> to vector<2x32xf32>
    %209 = math.tanh %207 : vector<2x32xf32>
    %210 = arith.mulf %208, %209 : vector<2x32xf32>
    %c2_58 = arith.constant 2 : index
    %c0_59 = arith.constant 0 : index
    %211 = vector.load %arg16[%c2_58, %c0_59] : memref<16x32xf32, #tpu.memory_space<vmem>>, vector<2x32xf32>
    tpu.vector_store %arg16[%c2_58, %c0_59], %210 {strides = array<i32>} : memref<16x32xf32, #tpu.memory_space<vmem>>, vector<2x32xf32>,
    %212 = vector.extract_strided_slice %169 {offsets = [4, 0], sizes = [2, 128], strides = [1, 1]} : vector<16x128xf32> to vector<2x128xf32>
    %cst_60 = arith.constant dense<0.000000e+00> : vector<2x128xf32>
    %213 = tpu.matmul %210, %1, %cst_60 {dimension_numbers = #tpu.dot_dimension_numbers<[1], [0], [0], [1], [0, 0, 1, 1], [], []>} : vector<2x32xf32>, vector<32x128xf32>, vector<2x128xf32> -> vector<2x128xf32>
    %214 = arith.addf %212, %213 : vector<2x128xf32>
    %215 = arith.negf %214 : vector<2x128xf32>
    %216 = math.exp %215 : vector<2x128xf32>
    %cst_61 = arith.constant 1.000000e+00 : f32
    %217 = vector.broadcast %cst_61 : f32 to vector<2x128xf32>
    %218 = arith.addf %217, %216 : vector<2x128xf32>
    %219 = arith.divf %217, %218 : vector<2x128xf32>
    %220 = math.tanh %214 : vector<2x128xf32>
    %221 = vector.extract_strided_slice %219 {offsets = [0, 32], sizes = [2, 32], strides = [1, 1]} : vector<2x128xf32> to vector<2x32xf32>
    %222 = arith.mulf %221, %207 : vector<2x32xf32>
    %223 = vector.extract_strided_slice %219 {offsets = [0, 0], sizes = [2, 32], strides = [1, 1]} : vector<2x128xf32> to vector<2x32xf32>
    %224 = vector.extract_strided_slice %220 {offsets = [0, 64], sizes = [2, 32], strides = [1, 1]} : vector<2x128xf32> to vector<2x32xf32>
    %225 = arith.mulf %223, %224 : vector<2x32xf32>
    %226 = arith.addf %222, %225 : vector<2x32xf32>
    %227 = vector.extract_strided_slice %219 {offsets = [0, 96], sizes = [2, 32], strides = [1, 1]} : vector<2x128xf32> to vector<2x32xf32>
    %228 = math.tanh %226 : vector<2x32xf32>
    %229 = arith.mulf %227, %228 : vector<2x32xf32>
    %c4_62 = arith.constant 4 : index
    %c0_63 = arith.constant 0 : index
    %230 = vector.load %arg16[%c4_62, %c0_63] : memref<16x32xf32, #tpu.memory_space<vmem>>, vector<2x32xf32>
    tpu.vector_store %arg16[%c4_62, %c0_63], %229 {strides = array<i32>} : memref<16x32xf32, #tpu.memory_space<vmem>>, vector<2x32xf32>,
    %231 = vector.extract_strided_slice %169 {offsets = [6, 0], sizes = [2, 128], strides = [1, 1]} : vector<16x128xf32> to vector<2x128xf32>
    %cst_64 = arith.constant dense<0.000000e+00> : vector<2x128xf32>
    %232 = tpu.matmul %229, %1, %cst_64 {dimension_numbers = #tpu.dot_dimension_numbers<[1], [0], [0], [1], [0, 0, 1, 1], [], []>} : vector<2x32xf32>, vector<32x128xf32>, vector<2x128xf32> -> vector<2x128xf32>
    %233 = arith.addf %231, %232 : vector<2x128xf32>
    %234 = arith.negf %233 : vector<2x128xf32>
    %235 = math.exp %234 : vector<2x128xf32>
    %cst_65 = arith.constant 1.000000e+00 : f32
    %236 = vector.broadcast %cst_65 : f32 to vector<2x128xf32>
    %237 = arith.addf %236, %235 : vector<2x128xf32>
    %238 = arith.divf %236, %237 : vector<2x128xf32>
    %239 = math.tanh %233 : vector<2x128xf32>
    %240 = vector.extract_strided_slice %238 {offsets = [0, 32], sizes = [2, 32], strides = [1, 1]} : vector<2x128xf32> to vector<2x32xf32>
    %241 = arith.mulf %240, %226 : vector<2x32xf32>
    %242 = vector.extract_strided_slice %238 {offsets = [0, 0], sizes = [2, 32], strides = [1, 1]} : vector<2x128xf32> to vector<2x32xf32>
    %243 = vector.extract_strided_slice %239 {offsets = [0, 64], sizes = [2, 32], strides = [1, 1]} : vector<2x128xf32> to vector<2x32xf32>
    %244 = arith.mulf %242, %243 : vector<2x32xf32>
    %245 = arith.addf %241, %244 : vector<2x32xf32>
    %246 = vector.extract_strided_slice %238 {offsets = [0, 96], sizes = [2, 32], strides = [1, 1]} : vector<2x128xf32> to vector<2x32xf32>
    %247 = math.tanh %245 : vector<2x32xf32>
    %248 = arith.mulf %246, %247 : vector<2x32xf32>
    %c6_66 = arith.constant 6 : index
    %c0_67 = arith.constant 0 : index
    %249 = vector.load %arg16[%c6_66, %c0_67] : memref<16x32xf32, #tpu.memory_space<vmem>>, vector<2x32xf32>
    tpu.vector_store %arg16[%c6_66, %c0_67], %248 {strides = array<i32>} : memref<16x32xf32, #tpu.memory_space<vmem>>, vector<2x32xf32>,
    %250 = vector.extract_strided_slice %169 {offsets = [8, 0], sizes = [2, 128], strides = [1, 1]} : vector<16x128xf32> to vector<2x128xf32>
    %cst_68 = arith.constant dense<0.000000e+00> : vector<2x128xf32>
    %251 = tpu.matmul %248, %1, %cst_68 {dimension_numbers = #tpu.dot_dimension_numbers<[1], [0], [0], [1], [0, 0, 1, 1], [], []>} : vector<2x32xf32>, vector<32x128xf32>, vector<2x128xf32> -> vector<2x128xf32>
    %252 = arith.addf %250, %251 : vector<2x128xf32>
    %253 = arith.negf %252 : vector<2x128xf32>
    %254 = math.exp %253 : vector<2x128xf32>
    %cst_69 = arith.constant 1.000000e+00 : f32
    %255 = vector.broadcast %cst_69 : f32 to vector<2x128xf32>
    %256 = arith.addf %255, %254 : vector<2x128xf32>
    %257 = arith.divf %255, %256 : vector<2x128xf32>
    %258 = math.tanh %252 : vector<2x128xf32>
    %259 = vector.extract_strided_slice %257 {offsets = [0, 32], sizes = [2, 32], strides = [1, 1]} : vector<2x128xf32> to vector<2x32xf32>
    %260 = arith.mulf %259, %245 : vector<2x32xf32>
    %261 = vector.extract_strided_slice %257 {offsets = [0, 0], sizes = [2, 32], strides = [1, 1]} : vector<2x128xf32> to vector<2x32xf32>
    %262 = vector.extract_strided_slice %258 {offsets = [0, 64], sizes = [2, 32], strides = [1, 1]} : vector<2x128xf32> to vector<2x32xf32>
    %263 = arith.mulf %261, %262 : vector<2x32xf32>
    %264 = arith.addf %260, %263 : vector<2x32xf32>
    %265 = vector.extract_strided_slice %257 {offsets = [0, 96], sizes = [2, 32], strides = [1, 1]} : vector<2x128xf32> to vector<2x32xf32>
    %266 = math.tanh %264 : vector<2x32xf32>
    %267 = arith.mulf %265, %266 : vector<2x32xf32>
    %c8_70 = arith.constant 8 : index
    %c0_71 = arith.constant 0 : index
    %268 = vector.load %arg16[%c8_70, %c0_71] : memref<16x32xf32, #tpu.memory_space<vmem>>, vector<2x32xf32>
    tpu.vector_store %arg16[%c8_70, %c0_71], %267 {strides = array<i32>} : memref<16x32xf32, #tpu.memory_space<vmem>>, vector<2x32xf32>,
    %269 = vector.extract_strided_slice %169 {offsets = [10, 0], sizes = [2, 128], strides = [1, 1]} : vector<16x128xf32> to vector<2x128xf32>
    %cst_72 = arith.constant dense<0.000000e+00> : vector<2x128xf32>
    %270 = tpu.matmul %267, %1, %cst_72 {dimension_numbers = #tpu.dot_dimension_numbers<[1], [0], [0], [1], [0, 0, 1, 1], [], []>} : vector<2x32xf32>, vector<32x128xf32>, vector<2x128xf32> -> vector<2x128xf32>
    %271 = arith.addf %269, %270 : vector<2x128xf32>
    %272 = arith.negf %271 : vector<2x128xf32>
    %273 = math.exp %272 : vector<2x128xf32>
    %cst_73 = arith.constant 1.000000e+00 : f32
    %274 = vector.broadcast %cst_73 : f32 to vector<2x128xf32>
    %275 = arith.addf %274, %273 : vector<2x128xf32>
    %276 = arith.divf %274, %275 : vector<2x128xf32>
    %277 = math.tanh %271 : vector<2x128xf32>
    %278 = vector.extract_strided_slice %276 {offsets = [0, 32], sizes = [2, 32], strides = [1, 1]} : vector<2x128xf32> to vector<2x32xf32>
    %279 = arith.mulf %278, %264 : vector<2x32xf32>
    %280 = vector.extract_strided_slice %276 {offsets = [0, 0], sizes = [2, 32], strides = [1, 1]} : vector<2x128xf32> to vector<2x32xf32>
    %281 = vector.extract_strided_slice %277 {offsets = [0, 64], sizes = [2, 32], strides = [1, 1]} : vector<2x128xf32> to vector<2x32xf32>
    %282 = arith.mulf %280, %281 : vector<2x32xf32>
    %283 = arith.addf %279, %282 : vector<2x32xf32>
    %284 = vector.extract_strided_slice %276 {offsets = [0, 96], sizes = [2, 32], strides = [1, 1]} : vector<2x128xf32> to vector<2x32xf32>
    %285 = math.tanh %283 : vector<2x32xf32>
    %286 = arith.mulf %284, %285 : vector<2x32xf32>
    %c10_74 = arith.constant 10 : index
    %c0_75 = arith.constant 0 : index
    %287 = vector.load %arg16[%c10_74, %c0_75] : memref<16x32xf32, #tpu.memory_space<vmem>>, vector<2x32xf32>
    tpu.vector_store %arg16[%c10_74, %c0_75], %286 {strides = array<i32>} : memref<16x32xf32, #tpu.memory_space<vmem>>, vector<2x32xf32>,
    %288 = vector.extract_strided_slice %169 {offsets = [12, 0], sizes = [2, 128], strides = [1, 1]} : vector<16x128xf32> to vector<2x128xf32>
    %cst_76 = arith.constant dense<0.000000e+00> : vector<2x128xf32>
    %289 = tpu.matmul %286, %1, %cst_76 {dimension_numbers = #tpu.dot_dimension_numbers<[1], [0], [0], [1], [0, 0, 1, 1], [], []>} : vector<2x32xf32>, vector<32x128xf32>, vector<2x128xf32> -> vector<2x128xf32>
    %290 = arith.addf %288, %289 : vector<2x128xf32>
    %291 = arith.negf %290 : vector<2x128xf32>
    %292 = math.exp %291 : vector<2x128xf32>
    %cst_77 = arith.constant 1.000000e+00 : f32
    %293 = vector.broadcast %cst_77 : f32 to vector<2x128xf32>
    %294 = arith.addf %293, %292 : vector<2x128xf32>
    %295 = arith.divf %293, %294 : vector<2x128xf32>
    %296 = math.tanh %290 : vector<2x128xf32>
    %297 = vector.extract_strided_slice %295 {offsets = [0, 32], sizes = [2, 32], strides = [1, 1]} : vector<2x128xf32> to vector<2x32xf32>
    %298 = arith.mulf %297, %283 : vector<2x32xf32>
    %299 = vector.extract_strided_slice %295 {offsets = [0, 0], sizes = [2, 32], strides = [1, 1]} : vector<2x128xf32> to vector<2x32xf32>
    %300 = vector.extract_strided_slice %296 {offsets = [0, 64], sizes = [2, 32], strides = [1, 1]} : vector<2x128xf32> to vector<2x32xf32>
    %301 = arith.mulf %299, %300 : vector<2x32xf32>
    %302 = arith.addf %298, %301 : vector<2x32xf32>
    %303 = vector.extract_strided_slice %295 {offsets = [0, 96], sizes = [2, 32], strides = [1, 1]} : vector<2x128xf32> to vector<2x32xf32>
    %304 = math.tanh %302 : vector<2x32xf32>
    %305 = arith.mulf %303, %304 : vector<2x32xf32>
    %c12_78 = arith.constant 12 : index
    %c0_79 = arith.constant 0 : index
    %306 = vector.load %arg16[%c12_78, %c0_79] : memref<16x32xf32, #tpu.memory_space<vmem>>, vector<2x32xf32>
    tpu.vector_store %arg16[%c12_78, %c0_79], %305 {strides = array<i32>} : memref<16x32xf32, #tpu.memory_space<vmem>>, vector<2x32xf32>,
    %307 = vector.extract_strided_slice %169 {offsets = [14, 0], sizes = [2, 128], strides = [1, 1]} : vector<16x128xf32> to vector<2x128xf32>
    %cst_80 = arith.constant dense<0.000000e+00> : vector<2x128xf32>
    %308 = tpu.matmul %305, %1, %cst_80 {dimension_numbers = #tpu.dot_dimension_numbers<[1], [0], [0], [1], [0, 0, 1, 1], [], []>} : vector<2x32xf32>, vector<32x128xf32>, vector<2x128xf32> -> vector<2x128xf32>
    %309 = arith.addf %307, %308 : vector<2x128xf32>
    %310 = arith.negf %309 : vector<2x128xf32>
    %311 = math.exp %310 : vector<2x128xf32>
    %cst_81 = arith.constant 1.000000e+00 : f32
    %312 = vector.broadcast %cst_81 : f32 to vector<2x128xf32>
    %313 = arith.addf %312, %311 : vector<2x128xf32>
    %314 = arith.divf %312, %313 : vector<2x128xf32>
    %315 = math.tanh %309 : vector<2x128xf32>
    %316 = vector.extract_strided_slice %314 {offsets = [0, 32], sizes = [2, 32], strides = [1, 1]} : vector<2x128xf32> to vector<2x32xf32>
    %317 = arith.mulf %316, %302 : vector<2x32xf32>
    %318 = vector.extract_strided_slice %314 {offsets = [0, 0], sizes = [2, 32], strides = [1, 1]} : vector<2x128xf32> to vector<2x32xf32>
    %319 = vector.extract_strided_slice %315 {offsets = [0, 64], sizes = [2, 32], strides = [1, 1]} : vector<2x128xf32> to vector<2x32xf32>
    %320 = arith.mulf %318, %319 : vector<2x32xf32>
    %321 = arith.addf %317, %320 : vector<2x32xf32>
    %322 = vector.extract_strided_slice %314 {offsets = [0, 96], sizes = [2, 32], strides = [1, 1]} : vector<2x128xf32> to vector<2x32xf32>
    %323 = math.tanh %321 : vector<2x32xf32>
    %324 = arith.mulf %322, %323 : vector<2x32xf32>
    %c14_82 = arith.constant 14 : index
    %c0_83 = arith.constant 0 : index
    %325 = vector.load %arg16[%c14_82, %c0_83] : memref<16x32xf32, #tpu.memory_space<vmem>>, vector<2x32xf32>
    tpu.vector_store %arg16[%c14_82, %c0_83], %324 {strides = array<i32>} : memref<16x32xf32, #tpu.memory_space<vmem>>, vector<2x32xf32>,
    %c0_84 = arith.constant 0 : index
    %c0_85 = arith.constant 0 : index
    %326 = vector.load %arg16[%c0_84, %c0_85] : memref<16x32xf32, #tpu.memory_space<vmem>>, vector<16x32xf32>
    %c0_86 = arith.constant 0 : index
    %c0_87 = arith.constant 0 : index
    %327 = vector.load %arg10[%c0_86, %c0_87] : memref<32x60xf32, #tpu.memory_space<vmem>>, vector<32x60xf32>
    %cst_88 = arith.constant dense<0.000000e+00> : vector<16x60xf32>
    %328 = tpu.matmul %326, %327, %cst_88 {dimension_numbers = #tpu.dot_dimension_numbers<[1], [0], [0], [1], [0, 0, 1, 1], [], []>} : vector<16x32xf32>, vector<32x60xf32>, vector<16x60xf32> -> vector<16x60xf32>
    %c0_89 = arith.constant 0 : index
    %c0_90 = arith.constant 0 : index
    %329 = vector.load %arg11[%c0_89, %c0_90] : memref<1x60xf32, #tpu.memory_space<vmem>>, vector<1x60xf32>
    %330 = vector.broadcast %329 : vector<1x60xf32> to vector<16x60xf32>
    %331 = arith.addf %328, %330 : vector<16x60xf32>
    %332 = tpu.iota {dimensions = array<i32: 1>} : vector<16x60xi32>
    %c30_i32 = arith.constant 30 : i32
    %333 = vector.broadcast %c30_i32 : i32 to vector<16x60xi32>
    %334 = arith.cmpi sge, %332, %333 : vector<16x60xi32>
    %335 = arith.negf %331 : vector<16x60xf32>
    %336 = math.exp %335 : vector<16x60xf32>
    %cst_91 = arith.constant 1.000000e+00 : f32
    %337 = vector.broadcast %cst_91 : f32 to vector<16x60xf32>
    %338 = arith.addf %337, %336 : vector<16x60xf32>
    %339 = arith.divf %337, %338 : vector<16x60xf32>
    %340 = arith.select %334, %339, %331 : vector<16x60xi1>, vector<16x60xf32>
    %c0_92 = arith.constant 0 : index
    %c0_93 = arith.constant 0 : index
    %341 = vector.load %arg12[%c0_92, %c0_93] : memref<16x60xf32, #tpu.memory_space<vmem>>, vector<16x60xf32>
    tpu.vector_store %arg12[%c0_92, %c0_93], %340 {strides = array<i32>} : memref<16x60xf32, #tpu.memory_space<vmem>>, vector<16x60xf32>,
    %c0_94 = arith.constant 0 : index
    %c0_95 = arith.constant 0 : index
    %c0_96 = arith.constant 0 : index
    %342 = vector.load %arg13[%c0_94, %c0_95, %c0_96] : memref<2x2x32xf32, #tpu.memory_space<vmem>>, vector<1x2x32xf32>
    %343 = vector.shape_cast %342 : vector<1x2x32xf32> to vector<2x32xf32>
    %344 = vector.shape_cast %162 : vector<2x32xf32> to vector<1x2x32xf32>
    tpu.vector_store %arg13[%c0_94, %c0_95, %c0_96], %344 {strides = array<i32>} : memref<2x2x32xf32, #tpu.memory_space<vmem>>, vector<1x2x32xf32>,
    %c1_97 = arith.constant 1 : index
    %c0_98 = arith.constant 0 : index
    %c0_99 = arith.constant 0 : index
    %345 = vector.load %arg13[%c1_97, %c0_98, %c0_99] : memref<2x2x32xf32, #tpu.memory_space<vmem>>, vector<1x2x32xf32>
    %346 = vector.shape_cast %345 : vector<1x2x32xf32> to vector<2x32xf32>
    %347 = vector.shape_cast %324 : vector<2x32xf32> to vector<1x2x32xf32>
    tpu.vector_store %arg13[%c1_97, %c0_98, %c0_99], %347 {strides = array<i32>} : memref<2x2x32xf32, #tpu.memory_space<vmem>>, vector<1x2x32xf32>,
    %c0_100 = arith.constant 0 : index
    %c0_101 = arith.constant 0 : index
    %c0_102 = arith.constant 0 : index
    %348 = vector.load %arg14[%c0_100, %c0_101, %c0_102] : memref<2x2x32xf32, #tpu.memory_space<vmem>>, vector<1x2x32xf32>
    %349 = vector.shape_cast %348 : vector<1x2x32xf32> to vector<2x32xf32>
    %350 = vector.shape_cast %159 : vector<2x32xf32> to vector<1x2x32xf32>
    tpu.vector_store %arg14[%c0_100, %c0_101, %c0_102], %350 {strides = array<i32>} : memref<2x2x32xf32, #tpu.memory_space<vmem>>, vector<1x2x32xf32>,
    %c1_103 = arith.constant 1 : index
    %c0_104 = arith.constant 0 : index
    %c0_105 = arith.constant 0 : index
    %351 = vector.load %arg14[%c1_103, %c0_104, %c0_105] : memref<2x2x32xf32, #tpu.memory_space<vmem>>, vector<1x2x32xf32>
    %352 = vector.shape_cast %351 : vector<1x2x32xf32> to vector<2x32xf32>
    %353 = vector.shape_cast %321 : vector<2x32xf32> to vector<1x2x32xf32>
    tpu.vector_store %arg14[%c1_103, %c0_104, %c0_105], %353 {strides = array<i32>} : memref<2x2x32xf32, #tpu.memory_space<vmem>>, vector<1x2x32xf32>,
    return
  }
  func.func @transform_0(%arg0: i32) -> (i32, i32) {
    %c0_i32 = arith.constant 0 : i32
    %c0_i32_0 = arith.constant 0 : i32
    %c0_i32_1 = arith.constant 0 : i32
    return %c0_i32, %c0_i32_0 : i32, i32
  }
  func.func @transform_1(%arg0: i32) -> (i32, i32, i32) {
    %c0_i32 = arith.constant 0 : i32
    %c0_i32_0 = arith.constant 0 : i32
    %c0_i32_1 = arith.constant 0 : i32
    %c0_i32_2 = arith.constant 0 : i32
    return %c0_i32, %c0_i32_0, %c0_i32_1 : i32, i32, i32
  }
  func.func @transform_2(%arg0: i32) -> (i32, i32, i32) {
    %c0_i32 = arith.constant 0 : i32
    %c0_i32_0 = arith.constant 0 : i32
    %c0_i32_1 = arith.constant 0 : i32
    %c0_i32_2 = arith.constant 0 : i32
    return %c0_i32, %c0_i32_0, %c0_i32_1 : i32, i32, i32
  }
  func.func @transform_3(%arg0: i32) -> (i32, i32) {
    %c0_i32 = arith.constant 0 : i32
    %c0_i32_0 = arith.constant 0 : i32
    %c0_i32_1 = arith.constant 0 : i32
    return %c0_i32, %c0_i32_0 : i32, i32
  }
  func.func @transform_4(%arg0: i32) -> (i32, i32) {
    %c0_i32 = arith.constant 0 : i32
    %c0_i32_0 = arith.constant 0 : i32
    %c0_i32_1 = arith.constant 0 : i32
    return %c0_i32, %c0_i32_0 : i32, i32
  }
  func.func @transform_5(%arg0: i32) -> (i32, i32) {
    %c0_i32 = arith.constant 0 : i32
    %c0_i32_0 = arith.constant 0 : i32
    %c0_i32_1 = arith.constant 0 : i32
    return %c0_i32, %c0_i32_0 : i32, i32
  }
  func.func @transform_6(%arg0: i32) -> (i32, i32) {
    %c0_i32 = arith.constant 0 : i32
    %c0_i32_0 = arith.constant 0 : i32
    %c0_i32_1 = arith.constant 0 : i32
    return %c0_i32, %c0_i32_0 : i32, i32
  }
  func.func @transform_7(%arg0: i32) -> (i32, i32) {
    %c0_i32 = arith.constant 0 : i32
    %c0_i32_0 = arith.constant 0 : i32
    %c0_i32_1 = arith.constant 0 : i32
    return %c0_i32, %c0_i32_0 : i32, i32
  }
  func.func @transform_8(%arg0: i32) -> (i32, i32) {
    %c0_i32 = arith.constant 0 : i32
    %c0_i32_0 = arith.constant 0 : i32
    %c0_i32_1 = arith.constant 0 : i32
    return %c0_i32, %c0_i32_0 : i32, i32
  }
  func.func @transform_9(%arg0: i32) -> (i32, i32) {
    %c0_i32 = arith.constant 0 : i32
    %c0_i32_0 = arith.constant 0 : i32
    %c0_i32_1 = arith.constant 0 : i32
    return %c0_i32, %c0_i32_0 : i32, i32
  }
  func.func @transform_10(%arg0: i32) -> (i32, i32) {
    %c0_i32 = arith.constant 0 : i32
    %c0_i32_0 = arith.constant 0 : i32
    %c0_i32_1 = arith.constant 0 : i32
    return %c0_i32, %c0_i32_0 : i32, i32
  }
  func.func @transform_11(%arg0: i32) -> (i32, i32) {
    %c0_i32 = arith.constant 0 : i32
    %c0_i32_0 = arith.constant 0 : i32
    %c0_i32_1 = arith.constant 0 : i32
    return %c0_i32, %c0_i32_0 : i32, i32
  }
  func.func @transform_12(%arg0: i32) -> (i32, i32, i32) {
    %c0_i32 = arith.constant 0 : i32
    %c0_i32_0 = arith.constant 0 : i32
    %c0_i32_1 = arith.constant 0 : i32
    %c0_i32_2 = arith.constant 0 : i32
    return %c0_i32, %c0_i32_0, %c0_i32_1 : i32, i32, i32
  }
  func.func @transform_13(%arg0: i32) -> (i32, i32, i32) {
    %c0_i32 = arith.constant 0 : i32
    %c0_i32_0 = arith.constant 0 : i32
    %c0_i32_1 = arith.constant 0 : i32
    %c0_i32_2 = arith.constant 0 : i32
    return %c0_i32, %c0_i32_0, %c0_i32_1 : i32, i32, i32
  }
}

</mosaic_0001>

<bundles_post_ra>
// kernel: policy_net_forward.1
= control target key start
LH: loop header
LB: loop body
LE: loop exit
PB: predicated region body
PF: predicated region fallthrough
CT: control target
= control target key end

     0   :  { %19 = vsyncpa [#allocation5], 0  ;;  %s3445_s0 = inlined_call_operand.hbm [shape: f32[16,16], index: 0, kind: input, shape index: {}]   ;;  %s3446_s1 = inlined_call_operand.vmem [shape: f32[2,2,32], index: 1, kind: input, shape index: {}]   ;;  %s3447_s2 = inlined_call_operand.vmem [shape: f32[2,2,32], index: 2, kind: input, shape index: {}]   ;;  %s3448_s3 = inlined_call_operand.hbm [shape: f32[16,128], index: 3, kind: input, shape index: {}]   ;;  %s3449_s4 = inlined_call_operand.vmem [shape: f32[32,128], index: 4, kind: input, shape index: {}]   ;;  %s3450_s5 = inlined_call_operand.vmem [shape: f32[1,128], index: 5, kind: input, shape index: {}]   ;;  %s3451_s6 = inlined_call_operand.vmem [shape: f32[32,128], index: 6, kind: input, shape index: {}]   ;;  %s3452_s7 = inlined_call_operand.vmem [shape: f32[32,128], index: 7, kind: input, shape index: {}]   ;;  %s3453_s8 = inlined_call_operand.hbm [shape: f32[1,128], index: 8, kind: input, shape index: {}]   ;;  %s3454_s9 = inlined_call_operand.vmem [shape: f32[32,60], index: 9, kind: input, shape index: {}]   ;;  %s3455_s10 = inlined_call_operand.vmem [shape: f32[1,60], index: 10, kind: input, shape index: {}]   ;;  %s3456_s11 = inlined_call_operand.vmem [shape: f32[16,60], index: 11, kind: output, shape index: {0}]   ;;  %s3457_s12 = inlined_call_operand.hbm [shape: f32[2,2,32], index: 12, kind: output, shape index: {1}]   ;;  %s3458_s13 = inlined_call_operand.hbm [shape: f32[2,2,32], index: 13, kind: output, shape index: {2}]  }
   0x1   :  { %20 = vsyncpa [#allocation8], 0 }
   0x2   :  { %21 = vsyncpa [#allocation6], 0 }
   0x3   :  { %22 = vsyncpa [#allocation12], 0  ;;  %s2934_s25 = smov [#allocation7]   ;;  %s2935_s27 = smov [#allocation4]  }
   0x4   :  { %s44_s26 = sshll.u32 %s2934_s25, 4  ;;  %s28_s28 = sshll.u32 %s2935_s27, 4  ;;  %s45_s26 = int_to_ptr.vmem [resolvable:$true] %s44_s26  ;;  %s3018_s28 = int_to_ptr.vmem [resolvable:$true] %s28_s28 }
   0x5   :  { %s2816_s14 = scalar_lea.hbm %s3448_s3, 256 }
   0x6   :  { %p2817_p0 = scmp.ne.s32.totalorder %s3448_s3, %s2816_s14  ;;  %p2820_p1 = scmp.lt.u32.totalorder %s2816_s14, %s3448_s3 }
   0x8   :  { %p2822_p2 = pnand %p2820_p1, %p2817_p0 }
   0xa   :  { %2825 = shalt.err (!%p2822_p2)
}
   0xb   :  { %s2826_s19 = scalar_lea.vmem %s45_s26, 256  ;;  %p2831_p4 = scmp.lt.s32.totalorder %s45_s26, %s45_s26 }
   0xc   :  { %p2827_p3 = scmp.ne.s32.totalorder %s45_s26, %s2826_s19  ;;  %p2832_p5 = scmp.lt.s32.totalorder %s2826_s19, %s2826_s19 }
   0xe   :  { %p2833_p6 = por %p2832_p5, %p2831_p4 }
  0x10   :  { %p2834_p7 = pnand %p2833_p6, %p2827_p3 }
  0x12   :  { %2837 = shalt.err (!%p2834_p7)
}
  0x13   :  { %s2936_s20 = smov 128   ;;  %s2937_s21 = smov 8  }
  0x14   :  { %50 = dma.hbm_to_vmem [thread:$0]  %s3448_s3, 256, %s45_s26, [#allocation8], %s2936_s20, %s2936_s20, %s2937_s21  }
  0x15   :  { %s2838_s27 = scalar_lea.hbm %s3445_s0, 256 }
  0x16   :  { %p2839_p8 = scmp.ne.s32.totalorder %s3445_s0, %s2838_s27  ;;  %p2842_p9 = scmp.lt.u32.totalorder %s2838_s27, %s3445_s0 }
  0x18   :  { %p2844_p10 = pnand %p2842_p9, %p2839_p8 }
  0x1a   :  { %2847 = shalt.err (!%p2844_p10)
}
  0x1b   :  { %s2848_s16 = scalar_lea.vmem %s3018_s28, 256  ;;  %p2853_p12 = scmp.lt.s32.totalorder %s3018_s28, %s3018_s28 }
  0x1c   :  { %p2849_p11 = scmp.ne.s32.totalorder %s3018_s28, %s2848_s16  ;;  %p2854_p13 = scmp.lt.s32.totalorder %s2848_s16, %s2848_s16 }
  0x1e   :  { %p2855_p0 = por %p2854_p13, %p2853_p12 }
  0x20   :  { %p2856_p1 = pnand %p2855_p0, %p2849_p11 }
  0x22   :  { %2859 = shalt.err (!%p2856_p1)
}
  0x23   :  { %34 = dma.hbm_to_vmem [thread:$0]  %s3445_s0, 256, %s3018_s28, [#allocation5], %s2936_s20, %s2936_s20, %s2937_s21  }
  0x24   :  { %s2938_s17 = smov [#allocation9]   ;;  %s2860_s23 = scalar_lea.hbm %s3453_s8, 16 }
  0x25   :  { %s65_s18 = sshll.u32 %s2938_s17, 4  ;;  %p2861_p2 = scmp.ne.s32.totalorder %s3453_s8, %s2860_s23  ;;  %s66_s18 = int_to_ptr.vmem [resolvable:$true] %s65_s18 }
  0x26   :  { %p2864_p3 = scmp.lt.u32.totalorder %s2860_s23, %s3453_s8 }
  0x28   :  { %p2866_p4 = pnand %p2864_p3, %p2861_p2 }
  0x2a   :  { %2869 = shalt.err (!%p2866_p4)
}
  0x2b   :  { %s2870_s30 = scalar_lea.vmem %s66_s18, 16  ;;  %s2874_s0 = scalar_lea.vmem %s66_s18, 32 }
  0x2c   :  { %p2871_p5 = scmp.ne.s32.totalorder %s66_s18, %s2870_s30  ;;  %p2875_p6 = scmp.lt.s32.totalorder %s66_s18, %s66_s18 }
  0x2d   :  { %p2876_p7 = scmp.lt.s32.totalorder %s2874_s0, %s2870_s30 }
  0x2f   :  { %p2877_p8 = por %p2876_p7, %p2875_p6 }
  0x31   :  { %p2878_p9 = pnand %p2877_p8, %p2871_p5 }
  0x33   :  { %2881 = shalt.err (!%p2878_p9)
}
  0x34   :  { %68 = dma.hbm_to_vmem [thread:$0]  %s3453_s8, 16, %s66_s18, [#allocation8]  }
  0x35   :  { %2926 = dma.done.wait [#allocation5], 256  }
  0x36   :  { %2927 = vsyncadd [#allocation5], 4294967040 }
  0x37   :  { %2928 = dma.done.wait [#allocation8], 272  }
  0x38   :  { %2929 = vsyncadd [#allocation8], 4294967024  ;;  %v2939_v0 = vmov 0.0|0.0   ;;  %vm2940_vm0 = vmmov 0   ;;  %v2941_v1 = vmov 0.0   ;;  %vm101_vm1 = vcmask 130048  }
  0x39   :  { %2554 = vmatprep.subr.bf16.mxu1 %v2939_v0  ;;  %2360 = vmatprep.mubr.msk.f32.mxu1 %vm2940_vm0, %v2941_v1  ;;  %v92_v2 = vld [vmem:[#allocation7] sm:$0xff]  ;;  %v93_v3 = vld [vmem:[#allocation7 + $0x8] sm:$0xff]  ;;  %v82_v4 = vld [vmem:[%s3449_s4] sm:$0xff]  ;;  %vm185_vm2 = vcmask 261120   ;;  %s2942_s23 = smov 64   ;;  %vm292_vm3 = vcmask 254976  }
  0x3a   :  { %v2550_v5 = vpack.c.bf16 %v93_v3, %v92_v2  ;;  %v83_v6 = vld [vmem:[%s3449_s4 + $0x8] sm:$0xff]  ;;  %v90_v7 = vld [vmem:[#allocation4] sm:$0xff]  ;;  %v84_v9 = vld [vmem:[%s3449_s4 + $0x10] sm:$0xff]  ;;  %vm401_vm4 = vcmask 257026   ;;  %vm625_vm5 = vcmask 261126   ;;  %vm513_vm6 = vcmask 259076  }
  0x3b   :  { %v3070_v8 = vpack.c.bf16 %v83_v6, %v82_v4  ;;  %2349 = vmatprep.mubr.msk.f32.mxu0 %vm101_vm1, %v90_v7  ;;  %v85_v10 = vld [vmem:[%s3449_s4 + $0x18] sm:$0xff]  ;;  %v91_v11 = vld [vmem:[#allocation4 + $0x8] sm:$0xff]  ;;  %v183_v13 = vld [vmem:[%s3446_s1] sm:$0x3]  ;;  %s2946_s20 = smov [#allocation11]  }
  0x3c   :  { %2551 = vmatprep.subr.bf16.mxu0 %v2550_v5  ;;  %v3080_v12 = vpack.c.bf16 %v85_v10, %v84_v9  ;;  %v2204_v14 = vld [vmem:[%s3450_s5] ss:$0 sm:$0xff]  ;;  %s2943_s5 = smov 32   ;;  %s2185_s21 = sshll.u32 %s2946_s20, 4  ;;  %s2186_s21 = int_to_ptr.vmem [resolvable:$true] %s2185_s21 }
  0x3d   :  { %2556 = vmatpush3.bf16.msra.mxu1 %v3070_v8  ;;  %2553 = vmatpush3.bf16.msra.mxu0 %v2550_v5  ;;  %v184_v23 = vld [vmem:[%s3447_s2] sm:$0x3] }
  0x3e   :  { %2557 = vmatprep.subr.bf16.mxu1 %v2939_v0  ;;  %2560 = vmatprep.subr.bf16.mxu0 %v2939_v0 }
  0x40   :  { %2350 = vmatmul.mubr.msk.f32.vlgmr.msra.gmra.mrb[0].mxu0 %vm101_vm1, %v91_v11 }
  0x41   :  { %2559 = vmatpush3.bf16.msra.mxu1 %v3080_v12  ;;  %2562 = vmatpush3.bf16.msra.mxu0 %v3070_v8 }
  0x42   :  { %2563 = vmatprep.subr.bf16.mxu0 %v2939_v0  ;;  %2371 = vmatprep.mubr.msk.f32.mxu0 %vm2940_vm0, %v2941_v1 }
  0x43   :  { %2566 = vmatprep.subr.bf16.mxu1 %v2939_v0 }
  0x44   :  { %2361 = vmatmul.mubr.msk.f32.vlgmr.msra.gmra.mrb[0].mxu1 %vm185_vm2, %v183_v13 }
  0x45   :  { %2565 = vmatpush3.bf16.msra.mxu0 %v3080_v12  ;;  %2568 = vmatpush3.bf16.msra.mxu1 %v3070_v8 }
  0x46   :  { %2569 = vmatprep.subr.bf16.mxu1 %v2939_v0  ;;  %2382 = vmatprep.mubr.msk.f32.mxu1 %vm2940_vm0, %v2941_v1 }
  0x47   :  { %2572 = vmatprep.subr.bf16.mxu0 %v2939_v0 }
  0x49   :  { %2571 = vmatpush3.bf16.msra.mxu1 %v3080_v12 }
  0x4a   :  { %2578 = vmatprep.subr.bf16.mxu1 %v2939_v0 }
 0x113   :  { %v2351_v15 = vpop.f32.mrb[0].mxu0 }
 0x114   :  { %v3106_v16 = vadd.f32 %v2351_v15, %v2204_v14  ;;  %v174_v17 = vpop.f32.mrb[1].mxu0 }
 0x115   :  { %v3108_v18 = vadd.f32 %v2204_v14, %v174_v17 }
 0x117   :  { %v255_v19 = vpop.f32.mrb[0].mxu1 }
 0x118   :  { %v259_v20 = vadd.f32 %v255_v19, %v3108_v18  ;;  %v2362_v21 = vpop.f32.mrb[1].mxu1 }
 0x11a   :  { %2680 = vtanh.f32 %v259_v20  ;;  %v2208_v24 = vmul.f32 -1.442695, %v259_v20 }
 0x11c   :  { %2682 = vpow2.f32 %v2208_v24 }
 0x124   :  { %v2681_v22 = vpop.eup %2680 }
 0x125   :  { %273 = vrot.lane.b32.xlu0 %v2681_v22, %s2942_s23 }
 0x126   :  { %v2683_v25 = vpop.eup %2682 }
 0x127   :  { %v263_v26 = vadd.f32 1.0, %v2683_v25 }
 0x129   :  { %268 = vrot.lane.b32.xlu0 %v184_v23, %s2943_s5  ;;  %2684 = vrcp.f32 %v263_v26 }
 0x133   :  { %v2685_v27 = vpop.eup %2684 }
 0x197   :  { %v274_v28 = vpop.permute.xlu0 %273 }
 0x198   :  { %v276_v29 = vmul.f32 %v2685_v27, %v274_v28 }
 0x19a   :  { %278 = vrot.lane.b32.xlu1 %v276_v29, %s2943_s5 }
 0x19b   :  { %v269_v30 = vpop.permute.xlu0 %268 }
 0x19c   :  { %v271_v31 = vmul.f32 %v2685_v27, %v269_v30 }
 0x20c   :  { %v279_v32 = vpop.permute.xlu1 %278 }
 0x20d   :  { %v281_v33 = vadd.f32 %v279_v32, %v271_v31 }
 0x20f   :  { %2686 = vtanh.f32 %v281_v33  ;;  %v378_v49 = vrot.slane %v281_v33, 6 }
 0x219   :  { %v2687_v34 = vpop.eup %2686 }
 0x21a   :  { %284 = vrot.lane.b32.xlu1 %v2687_v34, %s2942_s23 }
 0x28c   :  { %v285_v35 = vpop.permute.xlu1 %284 }
 0x28d   :  { %v287_v36 = vmul.f32 %v2685_v27, %v285_v35 }
 0x28f   :  { %289 = vrot.lane.b32.xlu0 %v287_v36, %s2943_s5 }
 0x301   :  { %v290_v37 = vpop.permute.xlu0 %289 }
 0x302   :  { %293 = vst.msk [vmem:[#allocation2] sm:$0x3] %vm292_vm3, %v290_v37  ;;  %2372 = vmatmul.mubr.msk.f32.vlgmr.msra.gmra.mrb[2].mxu0 %vm185_vm2, %v290_v37 }
 0x303   :  { %2574 = vmatpush3.bf16.msra.mxu0 %v3070_v8  ;;  %2393 = vmatprep.mubr.msk.f32.mxu0 %vm2940_vm0, %v2941_v1 }
 0x304   :  { %2575 = vmatprep.subr.bf16.mxu0 %v2939_v0 }
 0x307   :  { %2577 = vmatpush3.bf16.msra.mxu0 %v3080_v12 }
 0x308   :  { %2584 = vmatprep.subr.bf16.mxu0 %v2939_v0 }
 0x3d5   :  { %v362_v38 = vpop.f32.mrb[2].mxu0 }
 0x3d6   :  { %v367_v39 = vrot.slane %v362_v38, 6  ;;  %v2373_v40 = vpop.f32.mrb[3].mxu0 }
 0x3d8   :  { %v369_v41 = vadd.f32 %v367_v39, %v3108_v18 }
 0x3da   :  { %2688 = vtanh.f32 %v369_v41  ;;  %v2210_v43 = vmul.f32 -1.442695, %v369_v41 }
 0x3dc   :  { %2690 = vpow2.f32 %v2210_v43 }
 0x3e4   :  { %v2689_v42 = vpop.eup %2688 }
 0x3e5   :  { %382 = vrot.lane.b32.xlu1 %v2689_v42, %s2942_s23 }
 0x3e6   :  { %v2691_v44 = vpop.eup %2690 }
 0x3e7   :  { %v373_v45 = vadd.f32 1.0, %v2691_v44 }
 0x3e9   :  { %2692 = vrcp.f32 %v373_v45 }
 0x3f3   :  { %v2693_v46 = vpop.eup %2692 }
 0x3f4   :  { %v380_v50 = vmul.f32 %v2693_v46, %v378_v49 }
 0x457   :  { %v383_v47 = vpop.permute.xlu1 %382 }
 0x458   :  { %v385_v48 = vmul.f32 %v2693_v46, %v383_v47 }
 0x45a   :  { %387 = vrot.lane.b32.xlu0 %v385_v48, %s2943_s5 }
 0x4cc   :  { %v388_v51 = vpop.permute.xlu0 %387 }
 0x4cd   :  { %v390_v52 = vadd.f32 %v388_v51, %v380_v50 }
 0x4cf   :  { %2694 = vtanh.f32 %v390_v52  ;;  %v490_v7 = vrot.slane %v390_v52, 6 }
 0x4d9   :  { %v2695_v53 = vpop.eup %2694 }
 0x4da   :  { %393 = vrot.lane.b32.xlu1 %v2695_v53, %s2942_s23 }
 0x54c   :  { %v394_v54 = vpop.permute.xlu1 %393 }
 0x54d   :  { %v3131_v55 = vmul.f32 %v2693_v46, %v394_v54 }
 0x54f   :  { %v403_v56 = vrot.slane %v3131_v55, 2 }
 0x551   :  { %404 = vrot.lane.b32.xlu0 %v403_v56, %s2943_s5 }
 0x5c3   :  { %v405_v57 = vpop.permute.xlu0 %404 }
 0x5c4   :  { %2383 = vmatmul.mubr.msk.f32.vlgmr.msra.gmra.mrb[2].mxu1 %vm185_vm2, %v405_v57 }
 0x5c5   :  { %2580 = vmatpush3.bf16.msra.mxu1 %v3070_v8  ;;  %2404 = vmatprep.mubr.msk.f32.mxu1 %vm2940_vm0, %v2941_v1 }
 0x5c6   :  { %2581 = vmatprep.subr.bf16.mxu1 %v2939_v0 }
 0x5c9   :  { %2583 = vmatpush3.bf16.msra.mxu1 %v3080_v12 }
 0x5ca   :  { %2590 = vmatprep.subr.bf16.mxu1 %v2939_v0 }
 0x697   :  { %v474_v58 = vpop.f32.mrb[2].mxu1 }
 0x698   :  { %v479_v59 = vrot.slane %v474_v58, 4  ;;  %v2384_v60 = vpop.f32.mrb[3].mxu1 }
 0x69a   :  { %v481_v61 = vadd.f32 %v479_v59, %v3108_v18 }
 0x69c   :  { %2696 = vtanh.f32 %v481_v61  ;;  %v2212_v63 = vmul.f32 -1.442695, %v481_v61 }
 0x69e   :  { %2698 = vpow2.f32 %v2212_v63 }
 0x6a6   :  { %v2697_v62 = vpop.eup %2696 }
 0x6a7   :  { %494 = vrot.lane.b32.xlu1 %v2697_v62, %s2942_s23 }
 0x6a8   :  { %v2699_v2 = vpop.eup %2698 }
 0x6a9   :  { %v485_v3 = vadd.f32 1.0, %v2699_v2 }
 0x6ab   :  { %2700 = vrcp.f32 %v485_v3 }
 0x6b5   :  { %v2701_v4 = vpop.eup %2700 }
 0x6b6   :  { %v492_v9 = vmul.f32 %v2701_v4, %v490_v7 }
 0x719   :  { %v495_v5 = vpop.permute.xlu1 %494 }
 0x71a   :  { %v497_v6 = vmul.f32 %v2701_v4, %v495_v5 }
 0x71c   :  { %499 = vrot.lane.b32.xlu0 %v497_v6, %s2943_s5 }
 0x78e   :  { %v500_v10 = vpop.permute.xlu0 %499 }
 0x78f   :  { %v502_v11 = vadd.f32 %v500_v10, %v492_v9 }
 0x791   :  { %2702 = vtanh.f32 %v502_v11  ;;  %v602_v31 = vrot.slane %v502_v11, 6 }
 0x79b   :  { %v2703_v13 = vpop.eup %2702 }
 0x79c   :  { %505 = vrot.lane.b32.xlu1 %v2703_v13, %s2942_s23 }
 0x80e   :  { %v506_v14 = vpop.permute.xlu1 %505 }
 0x80f   :  { %v3146_v15 = vmul.f32 %v2701_v4, %v506_v14 }
 0x811   :  { %v515_v17 = vrot.slane %v3146_v15, 4 }
 0x813   :  { %516 = vrot.lane.b32.xlu0 %v515_v17, %s2943_s5 }
 0x885   :  { %v517_v19 = vpop.permute.xlu0 %516 }
 0x886   :  { %2394 = vmatmul.mubr.msk.f32.vlgmr.msra.gmra.mrb[4].mxu0 %vm185_vm2, %v517_v19 }
 0x887   :  { %2586 = vmatpush3.bf16.msra.mxu0 %v3070_v8  ;;  %2415 = vmatprep.mubr.msk.f32.mxu0 %vm2940_vm0, %v2941_v1 }
 0x888   :  { %2587 = vmatprep.subr.bf16.mxu0 %v2939_v0 }
 0x88b   :  { %2589 = vmatpush3.bf16.msra.mxu0 %v3080_v12 }
 0x88c   :  { %2596 = vmatprep.subr.bf16.mxu0 %v2939_v0 }
 0x959   :  { %v586_v20 = vpop.f32.mrb[4].mxu0 }
 0x95a   :  { %v591_v21 = vrot.slane %v586_v20, 2  ;;  %v2395_v22 = vpop.f32.mrb[5].mxu0 }
 0x95c   :  { %v593_v23 = vadd.f32 %v591_v21, %v3108_v18 }
 0x95e   :  { %2704 = vtanh.f32 %v593_v23  ;;  %v2214_v25 = vmul.f32 -1.442695, %v593_v23 }
 0x960   :  { %2706 = vpow2.f32 %v2214_v25 }
 0x968   :  { %v2705_v24 = vpop.eup %2704 }
 0x969   :  { %606 = vrot.lane.b32.xlu1 %v2705_v24, %s2942_s23 }
 0x96a   :  { %v2707_v26 = vpop.eup %2706 }
 0x96b   :  { %v597_v27 = vadd.f32 1.0, %v2707_v26 }
 0x96d   :  { %2708 = vrcp.f32 %v597_v27 }
 0x977   :  { %v2709_v28 = vpop.eup %2708 }
 0x978   :  { %v604_v32 = vmul.f32 %v2709_v28, %v602_v31 }
 0x9db   :  { %v607_v29 = vpop.permute.xlu1 %606 }
 0x9dc   :  { %v609_v30 = vmul.f32 %v2709_v28, %v607_v29 }
 0x9de   :  { %611 = vrot.lane.b32.xlu0 %v609_v30, %s2943_s5 }
 0xa50   :  { %v612_v33 = vpop.permute.xlu0 %611 }
 0xa51   :  { %v614_v34 = vadd.f32 %v612_v33, %v604_v32 }
 0xa53   :  { %2710 = vtanh.f32 %v614_v34  ;;  %v711_v49 = vrot.slane %v614_v34, 6 }
 0xa5d   :  { %v2711_v18 = vpop.eup %2710 }
 0xa5e   :  { %617 = vrot.lane.b32.xlu1 %v2711_v18, %s2942_s23 }
 0xad0   :  { %v618_v35 = vpop.permute.xlu1 %617 }
 0xad1   :  { %v3161_v36 = vmul.f32 %v2709_v28, %v618_v35 }
 0xad3   :  { %v627_v37 = vrot.slane %v3161_v36, 6 }
 0xad5   :  { %628 = vrot.lane.b32.xlu0 %v627_v37, %s2943_s5 }
 0xb47   :  { %v629_v38 = vpop.permute.xlu0 %628 }
 0xb48   :  { %2405 = vmatmul.mubr.msk.f32.vlgmr.msra.gmra.mrb[4].mxu1 %vm185_vm2, %v629_v38 }
 0xb49   :  { %2592 = vmatpush3.bf16.msra.mxu1 %v3070_v8  ;;  %2426 = vmatprep.mubr.msk.f32.mxu1 %vm2940_vm0, %v2941_v1 }
 0xb4a   :  { %2593 = vmatprep.subr.bf16.mxu1 %v2939_v0 }
 0xb4d   :  { %2595 = vmatpush3.bf16.msra.mxu1 %v3080_v12 }
 0xc1b   :  { %v698_v39 = vpop.f32.mrb[4].mxu1 }
 0xc1c   :  { %v702_v40 = vadd.f32 %v698_v39, %v3106_v16  ;;  %v2406_v41 = vpop.f32.mrb[5].mxu1 }
 0xc1e   :  { %2712 = vtanh.f32 %v702_v40  ;;  %v2216_v43 = vmul.f32 -1.442695, %v702_v40 }
 0xc20   :  { %2714 = vpow2.f32 %v2216_v43 }
 0xc28   :  { %v2713_v42 = vpop.eup %2712 }
 0xc29   :  { %715 = vrot.lane.b32.xlu1 %v2713_v42, %s2942_s23 }
 0xc2a   :  { %v2715_v44 = vpop.eup %2714 }
 0xc2b   :  { %v706_v45 = vadd.f32 1.0, %v2715_v44 }
 0xc2d   :  { %2716 = vrcp.f32 %v706_v45 }
 0xc37   :  { %v2717_v46 = vpop.eup %2716 }
 0xc38   :  { %v713_v50 = vmul.f32 %v2717_v46, %v711_v49 }
 0xc9b   :  { %v716_v47 = vpop.permute.xlu1 %715 }
 0xc9c   :  { %v718_v48 = vmul.f32 %v2717_v46, %v716_v47 }
 0xc9e   :  { %720 = vrot.lane.b32.xlu0 %v718_v48, %s2943_s5 }
 0xd10   :  { %v721_v51 = vpop.permute.xlu0 %720 }
 0xd11   :  { %v723_v52 = vadd.f32 %v721_v51, %v713_v50 }
 0xd13   :  { %2718 = vtanh.f32 %v723_v52 }
 0xd1d   :  { %v2719_v53 = vpop.eup %2718 }
 0xd1e   :  { %726 = vrot.lane.b32.xlu1 %v2719_v53, %s2942_s23 }
 0xd90   :  { %v727_v54 = vpop.permute.xlu1 %726 }
 0xd91   :  { %v729_v56 = vmul.f32 %v2717_v46, %v727_v54 }
 0xd93   :  { %731 = vrot.lane.b32.xlu0 %v729_v56, %s2943_s5  ;;  %v1067_v56 = vld [vmem:[%s3451_s6] sm:$0xff] }
 0xe05   :  { %v732_v57 = vpop.permute.xlu0 %731 }
 0xe06   :  { %734 = vst.msk [vmem:[#allocation2 + $0x8] sm:$0x3] %vm292_vm3, %v732_v57  ;;  %2416 = vmatmul.mubr.msk.f32.vlgmr.msra.gmra.mrb[6].mxu0 %vm185_vm2, %v732_v57  ;;  %v1068_v57 = vld [vmem:[%s3451_s6 + $0x8] sm:$0xff] }
 0xe07   :  { %2598 = vmatpush3.bf16.msra.mxu0 %v3070_v8  ;;  %2437 = vmatprep.mubr.msk.f32.mxu0 %vm2940_vm0, %v2941_v1 }
 0xe08   :  { %2599 = vmatprep.subr.bf16.mxu0 %v2939_v0 }
 0xe0b   :  { %2601 = vmatpush3.bf16.msra.mxu0 %v3080_v12  ;;  %v819_v12 = vrot.slane %v723_v52, 6 }
 0xe0c   :  { %2610 = vmatprep.subr.bf16.mxu0 %v2939_v0 }
 0xed9   :  { %v803_v58 = vpop.f32.mrb[6].mxu0 }
 0xeda   :  { %v808_v59 = vrot.slane %v803_v58, 6  ;;  %v2417_v60 = vpop.f32.mrb[7].mxu0  ;;  %v2602_v58 = vpack.c.bf16 %v1068_v57, %v1067_v56 }
 0xedb   :  { %v1069_v60 = vld [vmem:[%s3451_s6 + $0x10] sm:$0xff] }
 0xedc   :  { %v810_v61 = vadd.f32 %v808_v59, %v3106_v16  ;;  %2603 = vmatprep.subr.bf16.mxu1 %v2602_v58  ;;  %v86_v59 = vld [vmem:[%s3452_s7] sm:$0xff] }
 0xede   :  { %2720 = vtanh.f32 %v810_v61  ;;  %v2218_v63 = vmul.f32 -1.442695, %v810_v61 }
 0xee0   :  { %2722 = vpow2.f32 %v2218_v63  ;;  %v88_v63 = vld [vmem:[%s3452_s7 + $0x10] sm:$0xff] }
 0xee8   :  { %v2721_v62 = vpop.eup %2720 }
 0xee9   :  { %823 = vrot.lane.b32.xlu1 %v2721_v62, %s2942_s23  ;;  %v1070_v62 = vld [vmem:[%s3451_s6 + $0x18] sm:$0xff] }
 0xeea   :  { %v2723_v8 = vpop.eup %2722 }
 0xeeb   :  { %v814_v2 = vadd.f32 1.0, %v2723_v8  ;;  %v89_v8 = vld [vmem:[%s3452_s7 + $0x18] sm:$0xff] }
 0xeed   :  { %2724 = vrcp.f32 %v814_v2  ;;  %v2606_v2 = vpack.c.bf16 %v1070_v62, %v1069_v60 }
 0xef7   :  { %v2725_v3 = vpop.eup %2724 }
 0xef8   :  { %v821_v6 = vmul.f32 %v2725_v3, %v819_v12 }
 0xf5b   :  { %v824_v4 = vpop.permute.xlu1 %823 }
 0xf5c   :  { %v826_v5 = vmul.f32 %v2725_v3, %v824_v4  ;;  %v2226_v4 = vld [vmem:[%s3446_s1 + $0x2] sm:$0x3]  ;;  %s2944_s1 = smov 96  }
 0xf5e   :  { %828 = vrot.lane.b32.xlu0 %v826_v5, %s2943_s5 }
 0xfd0   :  { %v829_v7 = vpop.permute.xlu0 %828 }
 0xfd1   :  { %v831_v9 = vadd.f32 %v829_v7, %v821_v6  ;;  %v2227_v7 = vld [vmem:[%s3447_s2 + $0x2] sm:$0x3] }
 0xfd3   :  { %2726 = vtanh.f32 %v831_v9  ;;  %v930_v30 = vrot.slane %v831_v9, 6 }
 0xfdd   :  { %v2727_v10 = vpop.eup %2726 }
 0xfde   :  { %834 = vrot.lane.b32.xlu1 %v2727_v10, %s2942_s23 }
0x1050   :  { %v835_v11 = vpop.permute.xlu1 %834 }
0x1051   :  { %v3188_v13 = vmul.f32 %v2725_v3, %v835_v11  ;;  %v3247_v3 = vpack.c.bf16 %v89_v8, %v88_v63 }
0x1053   :  { %v843_v14 = vrot.slane %v3188_v13, 2 }
0x1055   :  { %844 = vrot.lane.b32.xlu0 %v843_v14, %s2943_s5 }
0x10c7   :  { %v845_v17 = vpop.permute.xlu0 %844 }
0x10c8   :  { %2427 = vmatmul.mubr.msk.f32.vlgmr.msra.gmra.mrb[6].mxu1 %vm185_vm2, %v845_v17 }
0x10c9   :  { %2605 = vmatpush3.bf16.msra.mxu1 %v2602_v58 }
0x10ca   :  { %2607 = vmatprep.subr.bf16.mxu1 %v2606_v2 }
0x10cd   :  { %2609 = vmatpush3.bf16.msra.mxu1 %v2606_v2 }
0x10ce   :  { %2616 = vmatprep.subr.bf16.mxu1 %v2939_v0 }
0x119b   :  { %v914_v19 = vpop.f32.mrb[6].mxu1 }
0x119c   :  { %v919_v20 = vrot.slane %v914_v19, 4  ;;  %v2428_v21 = vpop.f32.mrb[7].mxu1  ;;  %v2223_v19 = vld [vmem:[#allocation9] ss:$0 sm:$0xff] }
0x119e   :  { %v921_v22 = vadd.f32 %v919_v20, %v3106_v16 }
0x11a0   :  { %2728 = vtanh.f32 %v921_v22  ;;  %v2220_v24 = vmul.f32 -1.442695, %v921_v22 }
0x11a2   :  { %2730 = vpow2.f32 %v2220_v24 }
0x11aa   :  { %v2729_v23 = vpop.eup %2728 }
0x11ab   :  { %934 = vrot.lane.b32.xlu1 %v2729_v23, %s2942_s23 }
0x11ac   :  { %v2731_v25 = vpop.eup %2730 }
0x11ad   :  { %v925_v26 = vadd.f32 1.0, %v2731_v25 }
0x11af   :  { %2732 = vrcp.f32 %v925_v26 }
0x11b9   :  { %v2733_v27 = vpop.eup %2732 }
0x11ba   :  { %v932_v31 = vmul.f32 %v2733_v27, %v930_v30 }
0x121d   :  { %v935_v28 = vpop.permute.xlu1 %934 }
0x121e   :  { %v937_v29 = vmul.f32 %v2733_v27, %v935_v28 }
0x1220   :  { %939 = vrot.lane.b32.xlu0 %v937_v29, %s2943_s5 }
0x1292   :  { %v940_v32 = vpop.permute.xlu0 %939 }
0x1293   :  { %v942_v33 = vadd.f32 %v940_v32, %v932_v31 }
0x1295   :  { %2734 = vtanh.f32 %v942_v33 }
0x129f   :  { %v2735_v34 = vpop.eup %2734 }
0x12a0   :  { %945 = vrot.lane.b32.xlu1 %v2735_v34, %s2942_s23 }
0x1312   :  { %v946_v18 = vpop.permute.xlu1 %945 }
0x1313   :  { %v948_v35 = vmul.f32 %v2733_v27, %v946_v18 }
0x1315   :  { %v954_v37 = vrot.slane %v948_v35, 4 }
0x1317   :  { %955 = vrot.lane.b32.xlu0 %v954_v37, %s2943_s5 }
0x1389   :  { %v956_v38 = vpop.permute.xlu0 %955 }
0x138a   :  { %2438 = vmatmul.mubr.msk.f32.vlgmr.msra.gmra.mrb[8].mxu0 %vm185_vm2, %v956_v38 }
0x138b   :  { %2459 = vmatprep.mubr.msk.f32.mxu0 %vm2940_vm0, %v2941_v1 }
0x145d   :  { %v1025_v39 = vpop.f32.mrb[8].mxu0 }
0x145e   :  { %v1030_v40 = vrot.slane %v1025_v39, 2  ;;  %v2439_v41 = vpop.f32.mrb[9].mxu0 }
0x1460   :  { %v1032_v42 = vadd.f32 %v1030_v40, %v3106_v16  ;;  %v1041_v16 = vrot.slane %v942_v33, 6 }
0x1462   :  { %2736 = vtanh.f32 %v1032_v42  ;;  %v2222_v44 = vmul.f32 -1.442695, %v1032_v42 }
0x1464   :  { %2738 = vpow2.f32 %v2222_v44 }
0x146c   :  { %v2737_v43 = vpop.eup %2736 }
0x146d   :  { %1045 = vrot.lane.b32.xlu1 %v2737_v43, %s2942_s23 }
0x146e   :  { %v2739_v45 = vpop.eup %2738 }
0x146f   :  { %v1036_v46 = vadd.f32 1.0, %v2739_v45 }
0x1471   :  { %2740 = vrcp.f32 %v1036_v46 }
0x147b   :  { %v2741_v47 = vpop.eup %2740 }
0x147c   :  { %v1043_v50 = vmul.f32 %v2741_v47, %v1041_v16 }
0x14df   :  { %v1046_v48 = vpop.permute.xlu1 %1045 }
0x14e0   :  { %v1048_v49 = vmul.f32 %v2741_v47, %v1046_v48 }
0x14e2   :  { %1050 = vrot.lane.b32.xlu0 %v1048_v49, %s2943_s5 }
0x14e6   :  { %398 = vrot.lane.b32.xlu0 %v3131_v55, %s2943_s5 }
0x14ea   :  { %622 = vrot.lane.b32.xlu0 %v3161_v36, %s2943_s5 }
0x14ee   :  { %950 = vrot.lane.b32.xlu0 %v948_v35, %s2943_s5 }
0x1554   :  { %v1051_v51 = vpop.permute.xlu0 %1050 }
0x1555   :  { %v3209_v52 = vadd.f32 %v1051_v51, %v1043_v50 }
0x1557   :  { %2742 = vtanh.f32 %v3209_v52 }
0x1558   :  { %v399_v53 = vpop.permute.xlu0 %398 }
0x1559   :  { %402 = vst.msk [vmem:[#allocation2] sm:$0xc] %vm401_vm4, %v399_v53 }
0x155c   :  { %v623_v54 = vpop.permute.xlu0 %622 }
0x155d   :  { %626 = vst.msk [vmem:[#allocation2] sm:$0xc0] %vm625_vm5, %v623_v54 }
0x1560   :  { %v951_v55 = vpop.permute.xlu0 %950 }
0x1561   :  { %v2743_v36 = vpop.eup %2742  ;;  %953 = vst.msk [vmem:[#allocation2 + $0x8] sm:$0x30] %vm513_vm6, %v951_v55 }
0x1562   :  { %1056 = vrot.lane.b32.xlu1 %v2743_v36, %s2942_s23 }
0x1566   :  { %510 = vrot.lane.b32.xlu1 %v3146_v15, %s2943_s5  ;;  %v87_v15 = vld [vmem:[%s3452_s7 + $0x8] sm:$0xff] }
0x1567   :  { %v3235_v61 = vpack.c.bf16 %v87_v15, %v86_v59 }
0x1569   :  { %2612 = vmatpush3.bf16.msra.mxu0 %v3235_v61 }
0x156a   :  { %839 = vrot.lane.b32.xlu1 %v3188_v13, %s2943_s5  ;;  %2613 = vmatprep.subr.bf16.mxu0 %v2939_v0 }
0x156d   :  { %2615 = vmatpush3.bf16.msra.mxu0 %v3247_v3 }
0x156e   :  { %2622 = vmatprep.subr.bf16.mxu0 %v2939_v0 }
0x1570   :  { %2460 = vmatmul.mubr.msk.f32.vlgmr.msra.gmra.mrb[10].mxu0 %vm185_vm2, %v2226_v4 }
0x1571   :  { %2624 = vmatpush3.bf16.msra.mxu0 %v3235_v61  ;;  %2481 = vmatprep.mubr.msk.f32.mxu0 %vm2940_vm0, %v2941_v1 }
0x1572   :  { %2625 = vmatprep.subr.bf16.mxu0 %v2939_v0 }
0x1575   :  { %2627 = vmatpush3.bf16.msra.mxu0 %v3247_v3 }
0x1576   :  { %2634 = vmatprep.subr.bf16.mxu0 %v2939_v0 }
0x15d4   :  { %v1057_v5 = vpop.permute.xlu1 %1056 }
0x15d5   :  { %v1059_v12 = vmul.f32 %v2741_v47, %v1057_v5 }
0x15d7   :  { %1061 = vrot.lane.b32.xlu1 %v1059_v12, %s2943_s5 }
0x15d8   :  { %v511_v6 = vpop.permute.xlu1 %510 }
0x15d9   :  { %514 = vst.msk [vmem:[#allocation2] sm:$0x30] %vm513_vm6, %v511_v6 }
0x15db   :  { %1245 = vrot.lane.b32.xlu1 %v2227_v7, %s2943_s5 }
0x15dc   :  { %v840_v9 = vpop.permute.xlu1 %839 }
0x15dd   :  { %842 = vst.msk [vmem:[#allocation2 + $0x8] sm:$0xc] %vm401_vm4, %v840_v9 }
0x15e0   :  { %v1065_v10 = vld [vmem:[#allocation2] sm:$0xff] }
0x15e1   :  { %2448 = vmatprep.mubr.msk.f32.mxu1 %vm185_vm2, %v1065_v10 }
0x1643   :  { %v1232_v14 = vpop.f32.mrb[10].mxu0 }
0x1644   :  { %v2461_v17 = vpop.f32.mrb[11].mxu0 }
0x1649   :  { %v1062_v11 = vpop.permute.xlu1 %1061 }
0x164a   :  { %1064 = vst.msk [vmem:[#allocation2 + $0x8] sm:$0xc0] %vm625_vm5, %v1062_v11  ;;  %2152 = vst.msk [vmem:[#allocation10 - $0x6] sm:$0xc0] %vm625_vm5, %v1062_v11 }
0x164d   :  { %v1246_v32 = vpop.permute.xlu1 %1245 }
0x1651   :  { %v1066_v13 = vld [vmem:[#allocation2 + $0x8] sm:$0xff] }
0x1652   :  { %2449 = vmatmul.mubr.msk.f32.vlgmr.msra.gmra.mrb[8].mxu1 %vm185_vm2, %v1066_v13 }
0x1653   :  { %2618 = vmatpush3.bf16.msra.mxu1 %v3235_v61  ;;  %2470 = vmatprep.mubr.msk.f32.mxu1 %vm2940_vm0, %v2941_v1 }
0x1654   :  { %2619 = vmatprep.subr.bf16.mxu1 %v2939_v0 }
0x1657   :  { %2621 = vmatpush3.bf16.msra.mxu1 %v3247_v3 }
0x1658   :  { %2628 = vmatprep.subr.bf16.mxu1 %v2939_v0 }
0x1725   :  { %v2450_v20 = vpop.f32.mrb[8].mxu1 }
0x1726   :  { %v3280_v21 = vadd.f32 %v2450_v20, %v2223_v19  ;;  %v1150_v22 = vpop.f32.mrb[9].mxu1 }
0x1727   :  { %v3282_v23 = vadd.f32 %v2223_v19, %v1150_v22 }
0x1729   :  { %v1236_v24 = vadd.f32 %v1232_v14, %v3282_v23 }
0x172b   :  { %2744 = vtanh.f32 %v1236_v24  ;;  %v2229_v26 = vmul.f32 -1.442695, %v1236_v24 }
0x172d   :  { %2746 = vpow2.f32 %v2229_v26 }
0x1735   :  { %v2745_v25 = vpop.eup %2744 }
0x1736   :  { %1250 = vrot.lane.b32.xlu0 %v2745_v25, %s2942_s23 }
0x1737   :  { %v2747_v27 = vpop.eup %2746 }
0x1738   :  { %v1240_v28 = vadd.f32 1.0, %v2747_v27 }
0x173a   :  { %2748 = vrcp.f32 %v1240_v28 }
0x1744   :  { %v2749_v29 = vpop.eup %2748 }
0x1745   :  { %v1248_v33 = vmul.f32 %v2749_v29, %v1246_v32 }
0x17a8   :  { %v1251_v30 = vpop.permute.xlu0 %1250 }
0x17a9   :  { %v1253_v31 = vmul.f32 %v2749_v29, %v1251_v30 }
0x17ab   :  { %1255 = vrot.lane.b32.xlu0 %v1253_v31, %s2943_s5 }
0x181d   :  { %v1256_v34 = vpop.permute.xlu0 %1255 }
0x181e   :  { %v1258_v18 = vadd.f32 %v1256_v34, %v1248_v33 }
0x1820   :  { %2750 = vtanh.f32 %v1258_v18  ;;  %v1354_v50 = vrot.slane %v1258_v18, 6 }
0x182a   :  { %v2751_v35 = vpop.eup %2750 }
0x182b   :  { %1261 = vrot.lane.b32.xlu1 %v2751_v35, %s2942_s23 }
0x189d   :  { %v1262_v37 = vpop.permute.xlu1 %1261 }
0x189e   :  { %v1264_v38 = vmul.f32 %v2749_v29, %v1262_v37 }
0x18a0   :  { %1266 = vrot.lane.b32.xlu0 %v1264_v38, %s2943_s5 }
0x1912   :  { %v1267_v39 = vpop.permute.xlu0 %1266 }
0x1913   :  { %1269 = vst.msk [vmem:[#allocation3] sm:$0x3] %vm292_vm3, %v1267_v39  ;;  %2471 = vmatmul.mubr.msk.f32.vlgmr.msra.gmra.mrb[10].mxu1 %vm185_vm2, %v1267_v39 }
0x1914   :  { %2630 = vmatpush3.bf16.msra.mxu1 %v3235_v61  ;;  %2492 = vmatprep.mubr.msk.f32.mxu1 %vm2940_vm0, %v2941_v1 }
0x1915   :  { %2631 = vmatprep.subr.bf16.mxu1 %v2939_v0 }
0x1918   :  { %2633 = vmatpush3.bf16.msra.mxu1 %v3247_v3 }
0x1919   :  { %2640 = vmatprep.subr.bf16.mxu1 %v2939_v0 }
0x19e6   :  { %v1338_v40 = vpop.f32.mrb[10].mxu1 }
0x19e7   :  { %v1343_v41 = vrot.slane %v1338_v40, 6  ;;  %v2472_v42 = vpop.f32.mrb[11].mxu1 }
0x19e9   :  { %v1345_v43 = vadd.f32 %v1343_v41, %v3282_v23 }
0x19eb   :  { %2752 = vtanh.f32 %v1345_v43  ;;  %v2231_v45 = vmul.f32 -1.442695, %v1345_v43 }
0x19ed   :  { %2754 = vpow2.f32 %v2231_v45 }
0x19f5   :  { %v2753_v44 = vpop.eup %2752 }
0x19f6   :  { %1358 = vrot.lane.b32.xlu1 %v2753_v44, %s2942_s23 }
0x19f7   :  { %v2755_v46 = vpop.eup %2754 }
0x19f8   :  { %v1349_v47 = vadd.f32 1.0, %v2755_v46 }
0x19fa   :  { %2756 = vrcp.f32 %v1349_v47 }
0x1a04   :  { %v2757_v48 = vpop.eup %2756 }
0x1a05   :  { %v1356_v51 = vmul.f32 %v2757_v48, %v1354_v50 }
0x1a68   :  { %v1359_v49 = vpop.permute.xlu1 %1358 }
0x1a69   :  { %v1361_v16 = vmul.f32 %v2757_v48, %v1359_v49 }
0x1a6b   :  { %1363 = vrot.lane.b32.xlu0 %v1361_v16, %s2943_s5 }
0x1add   :  { %v1364_v53 = vpop.permute.xlu0 %1363 }
0x1ade   :  { %v1366_v54 = vadd.f32 %v1364_v53, %v1356_v51 }
0x1ae0   :  { %2758 = vtanh.f32 %v1366_v54  ;;  %v1465_v7 = vrot.slane %v1366_v54, 6 }
0x1aea   :  { %v2759_v55 = vpop.eup %2758 }
0x1aeb   :  { %1369 = vrot.lane.b32.xlu1 %v2759_v55, %s2942_s23 }
0x1b5d   :  { %v1370_v36 = vpop.permute.xlu1 %1369 }
0x1b5e   :  { %v3301_v56 = vmul.f32 %v2757_v48, %v1370_v36 }
0x1b60   :  { %v1378_v57 = vrot.slane %v3301_v56, 2 }
0x1b62   :  { %1379 = vrot.lane.b32.xlu0 %v1378_v57, %s2943_s5 }
0x1bd4   :  { %v1380_v58 = vpop.permute.xlu0 %1379 }
0x1bd5   :  { %2482 = vmatmul.mubr.msk.f32.vlgmr.msra.gmra.mrb[12].mxu0 %vm185_vm2, %v1380_v58 }
0x1bd6   :  { %2636 = vmatpush3.bf16.msra.mxu0 %v3235_v61  ;;  %2503 = vmatprep.mubr.msk.f32.mxu0 %vm2940_vm0, %v2941_v1 }
0x1bd7   :  { %2637 = vmatprep.subr.bf16.mxu0 %v2939_v0 }
0x1bda   :  { %2639 = vmatpush3.bf16.msra.mxu0 %v3247_v3 }
0x1bdb   :  { %2646 = vmatprep.subr.bf16.mxu0 %v2939_v0 }
0x1ca8   :  { %v1449_v59 = vpop.f32.mrb[12].mxu0 }
0x1ca9   :  { %v1454_v15 = vrot.slane %v1449_v59, 4  ;;  %v2483_v60 = vpop.f32.mrb[13].mxu0 }
0x1cab   :  { %v1456_v62 = vadd.f32 %v1454_v15, %v3282_v23 }
0x1cad   :  { %2760 = vtanh.f32 %v1456_v62  ;;  %v2233_v8 = vmul.f32 -1.442695, %v1456_v62 }
0x1caf   :  { %2762 = vpow2.f32 %v2233_v8 }
0x1cb7   :  { %v2761_v63 = vpop.eup %2760 }
0x1cb8   :  { %1469 = vrot.lane.b32.xlu1 %v2761_v63, %s2942_s23 }
0x1cb9   :  { %v2763_v2 = vpop.eup %2762 }
0x1cba   :  { %v1460_v4 = vadd.f32 1.0, %v2763_v2 }
0x1cbc   :  { %2764 = vrcp.f32 %v1460_v4 }
0x1cc6   :  { %v2765_v5 = vpop.eup %2764 }
0x1cc7   :  { %v1467_v9 = vmul.f32 %v2765_v5, %v1465_v7 }
0x1d2a   :  { %v1470_v12 = vpop.permute.xlu1 %1469 }
0x1d2b   :  { %v1472_v6 = vmul.f32 %v2765_v5, %v1470_v12 }
0x1d2d   :  { %1474 = vrot.lane.b32.xlu0 %v1472_v6, %s2943_s5 }
0x1d9f   :  { %v1475_v10 = vpop.permute.xlu0 %1474 }
0x1da0   :  { %v1477_v11 = vadd.f32 %v1475_v10, %v1467_v9 }
0x1da2   :  { %2766 = vtanh.f32 %v1477_v11  ;;  %v1576_v34 = vrot.slane %v1477_v11, 6 }
0x1dac   :  { %v2767_v13 = vpop.eup %2766 }
0x1dad   :  { %1480 = vrot.lane.b32.xlu1 %v2767_v13, %s2942_s23 }
0x1e1f   :  { %v1481_v14 = vpop.permute.xlu1 %1480 }
0x1e20   :  { %v3316_v17 = vmul.f32 %v2765_v5, %v1481_v14 }
0x1e22   :  { %v1489_v19 = vrot.slane %v3316_v17, 4 }
0x1e24   :  { %1490 = vrot.lane.b32.xlu0 %v1489_v19, %s2943_s5 }
0x1e96   :  { %v1491_v20 = vpop.permute.xlu0 %1490 }
0x1e97   :  { %2493 = vmatmul.mubr.msk.f32.vlgmr.msra.gmra.mrb[12].mxu1 %vm185_vm2, %v1491_v20 }
0x1e98   :  { %2642 = vmatpush3.bf16.msra.mxu1 %v3235_v61  ;;  %2514 = vmatprep.mubr.msk.f32.mxu1 %vm2940_vm0, %v2941_v1 }
0x1e99   :  { %2643 = vmatprep.subr.bf16.mxu1 %v2939_v0 }
0x1e9c   :  { %2645 = vmatpush3.bf16.msra.mxu1 %v3247_v3 }
0x1e9d   :  { %2652 = vmatprep.subr.bf16.mxu1 %v2939_v0 }
0x1f6a   :  { %v1560_v22 = vpop.f32.mrb[12].mxu1 }
0x1f6b   :  { %v1565_v24 = vrot.slane %v1560_v22, 2  ;;  %v2494_v25 = vpop.f32.mrb[13].mxu1 }
0x1f6d   :  { %v1567_v26 = vadd.f32 %v1565_v24, %v3282_v23 }
0x1f6f   :  { %2768 = vtanh.f32 %v1567_v26  ;;  %v2235_v28 = vmul.f32 -1.442695, %v1567_v26 }
0x1f71   :  { %2770 = vpow2.f32 %v2235_v28 }
0x1f79   :  { %v2769_v27 = vpop.eup %2768 }
0x1f7a   :  { %1580 = vrot.lane.b32.xlu1 %v2769_v27, %s2942_s23 }
0x1f7b   :  { %v2771_v29 = vpop.eup %2770 }
0x1f7c   :  { %v1571_v30 = vadd.f32 1.0, %v2771_v29 }
0x1f7e   :  { %2772 = vrcp.f32 %v1571_v30 }
0x1f88   :  { %v2773_v31 = vpop.eup %2772 }
0x1f89   :  { %v1578_v18 = vmul.f32 %v2773_v31, %v1576_v34 }
0x1fec   :  { %v1581_v32 = vpop.permute.xlu1 %1580 }
0x1fed   :  { %v1583_v33 = vmul.f32 %v2773_v31, %v1581_v32 }
0x1fef   :  { %1585 = vrot.lane.b32.xlu0 %v1583_v33, %s2943_s5 }
0x2061   :  { %v1586_v35 = vpop.permute.xlu0 %1585 }
0x2062   :  { %v1588_v37 = vadd.f32 %v1586_v35, %v1578_v18 }
0x2064   :  { %2774 = vtanh.f32 %v1588_v37  ;;  %v1684_v51 = vrot.slane %v1588_v37, 6 }
0x206e   :  { %v2775_v23 = vpop.eup %2774 }
0x206f   :  { %1591 = vrot.lane.b32.xlu1 %v2775_v23, %s2942_s23 }
0x20e1   :  { %v1592_v38 = vpop.permute.xlu1 %1591 }
0x20e2   :  { %v3331_v39 = vmul.f32 %v2773_v31, %v1592_v38 }
0x20e4   :  { %v1600_v40 = vrot.slane %v3331_v39, 6 }
0x20e6   :  { %1601 = vrot.lane.b32.xlu0 %v1600_v40, %s2943_s5 }
0x2158   :  { %v1602_v41 = vpop.permute.xlu0 %1601 }
0x2159   :  { %2504 = vmatmul.mubr.msk.f32.vlgmr.msra.gmra.mrb[14].mxu0 %vm185_vm2, %v1602_v41 }
0x215a   :  { %2648 = vmatpush3.bf16.msra.mxu0 %v3235_v61  ;;  %2525 = vmatprep.mubr.msk.f32.mxu0 %vm2940_vm0, %v2941_v1 }
0x215b   :  { %2649 = vmatprep.subr.bf16.mxu0 %v2939_v0 }
0x215e   :  { %2651 = vmatpush3.bf16.msra.mxu0 %v3247_v3 }
0x222c   :  { %v1671_v42 = vpop.f32.mrb[14].mxu0 }
0x222d   :  { %v1675_v43 = vadd.f32 %v1671_v42, %v3280_v21  ;;  %v2505_v44 = vpop.f32.mrb[15].mxu0 }
0x222f   :  { %2776 = vtanh.f32 %v1675_v43  ;;  %v2237_v46 = vmul.f32 -1.442695, %v1675_v43 }
0x2231   :  { %2778 = vpow2.f32 %v2237_v46 }
0x2239   :  { %v2777_v45 = vpop.eup %2776 }
0x223a   :  { %1688 = vrot.lane.b32.xlu1 %v2777_v45, %s2942_s23 }
0x223b   :  { %v2779_v47 = vpop.eup %2778 }
0x223c   :  { %v1679_v48 = vadd.f32 1.0, %v2779_v47 }
0x223e   :  { %2780 = vrcp.f32 %v1679_v48 }
0x2248   :  { %v2781_v49 = vpop.eup %2780 }
0x2249   :  { %v1686_v53 = vmul.f32 %v2781_v49, %v1684_v51 }
0x22ac   :  { %v1689_v16 = vpop.permute.xlu1 %1688 }
0x22ad   :  { %v1691_v50 = vmul.f32 %v2781_v49, %v1689_v16 }
0x22af   :  { %1693 = vrot.lane.b32.xlu0 %v1691_v50, %s2943_s5 }
0x2321   :  { %v1694_v54 = vpop.permute.xlu0 %1693 }
0x2322   :  { %v1696_v55 = vadd.f32 %v1694_v54, %v1686_v53 }
0x2324   :  { %2782 = vtanh.f32 %v1696_v55 }
0x232e   :  { %v2783_v36 = vpop.eup %2782 }
0x232f   :  { %1699 = vrot.lane.b32.xlu1 %v2783_v36, %s2942_s23 }
0x23a1   :  { %v1700_v57 = vpop.permute.xlu1 %1699 }
0x23a2   :  { %v1702_v58 = vmul.f32 %v2781_v49, %v1700_v57 }
0x23a4   :  { %1704 = vrot.lane.b32.xlu0 %v1702_v58, %s2943_s5  ;;  %v2041_v58 = vld [vmem:[%s3454_s9 + $0x8] sm:$0xff] }
0x2416   :  { %v1705_v59 = vpop.permute.xlu0 %1704 }
0x2417   :  { %1707 = vst.msk [vmem:[#allocation3 + $0x8] sm:$0x3] %vm292_vm3, %v1705_v59  ;;  %2515 = vmatmul.mubr.msk.f32.vlgmr.msra.gmra.mrb[14].mxu1 %vm185_vm2, %v1705_v59 }
0x2418   :  { %2654 = vmatpush3.bf16.msra.mxu1 %v3235_v61  ;;  %2536 = vmatprep.mubr.msk.f32.mxu1 %vm2940_vm0, %v2941_v1 }
0x2419   :  { %2655 = vmatprep.subr.bf16.mxu1 %v2939_v0  ;;  %v1792_v0 = vrot.slane %v1696_v55, 6 }
0x241c   :  { %2657 = vmatpush3.bf16.msra.mxu1 %v3247_v3 }
0x24ea   :  { %v1776_v15 = vpop.f32.mrb[14].mxu1 }
0x24eb   :  { %v1781_v60 = vrot.slane %v1776_v15, 6  ;;  %v2516_v62 = vpop.f32.mrb[15].mxu1  ;;  %v2042_v15 = vld [vmem:[%s3454_s9 + $0x10] sm:$0xff] }
0x24ed   :  { %v1783_v63 = vadd.f32 %v1781_v60, %v3280_v21 }
0x24ef   :  { %2784 = vtanh.f32 %v1783_v63  ;;  %v2239_v2 = vmul.f32 -1.442695, %v1783_v63 }
0x24f1   :  { %2786 = vpow2.f32 %v2239_v2 }
0x24f9   :  { %v2785_v8 = vpop.eup %2784 }
0x24fa   :  { %1796 = vrot.lane.b32.xlu1 %v2785_v8, %s2942_s23 }
0x24fb   :  { %v2787_v4 = vpop.eup %2786 }
0x24fc   :  { %v1787_v61 = vadd.f32 1.0, %v2787_v4 }
0x24fe   :  { %2788 = vrcp.f32 %v1787_v61 }
0x2508   :  { %v2789_v5 = vpop.eup %2788 }
0x2509   :  { %v1794_v3 = vmul.f32 %v2789_v5, %v1792_v0 }
0x256c   :  { %v1797_v1 = vpop.permute.xlu1 %1796 }
0x256d   :  { %v1799_v12 = vmul.f32 %v2789_v5, %v1797_v1 }
0x256f   :  { %1801 = vrot.lane.b32.xlu0 %v1799_v12, %s2943_s5 }
0x25e1   :  { %v1802_v6 = vpop.permute.xlu0 %1801 }
0x25e2   :  { %v1804_v7 = vadd.f32 %v1802_v6, %v1794_v3 }
0x25e4   :  { %2790 = vtanh.f32 %v1804_v7  ;;  %v1903_v32 = vrot.slane %v1804_v7, 6 }
0x25ee   :  { %v2791_v9 = vpop.eup %2790 }
0x25ef   :  { %1807 = vrot.lane.b32.xlu1 %v2791_v9, %s2942_s23 }
0x2661   :  { %v1808_v10 = vpop.permute.xlu1 %1807 }
0x2662   :  { %v3357_v11 = vmul.f32 %v2789_v5, %v1808_v10 }
0x2664   :  { %v1816_v13 = vrot.slane %v3357_v11, 2 }
0x2666   :  { %1817 = vrot.lane.b32.xlu0 %v1816_v13, %s2943_s5 }
0x26d8   :  { %v1818_v14 = vpop.permute.xlu0 %1817 }
0x26d9   :  { %2526 = vmatmul.mubr.msk.f32.vlgmr.msra.gmra.mrb[16].mxu0 %vm185_vm2, %v1818_v14 }
0x27ac   :  { %v1887_v19 = vpop.f32.mrb[16].mxu0 }
0x27ad   :  { %v1892_v20 = vrot.slane %v1887_v19, 4  ;;  %v2527_v22 = vpop.f32.mrb[17].mxu0 }
0x27af   :  { %v1894_v24 = vadd.f32 %v1892_v20, %v3280_v21 }
0x27b1   :  { %2792 = vtanh.f32 %v1894_v24  ;;  %v2241_v26 = vmul.f32 -1.442695, %v1894_v24 }
0x27b3   :  { %2794 = vpow2.f32 %v2241_v26 }
0x27bb   :  { %v2793_v25 = vpop.eup %2792 }
0x27bc   :  { %1907 = vrot.lane.b32.xlu1 %v2793_v25, %s2942_s23 }
0x27bd   :  { %v2795_v27 = vpop.eup %2794 }
0x27be   :  { %v1898_v28 = vadd.f32 1.0, %v2795_v27 }
0x27c0   :  { %2796 = vrcp.f32 %v1898_v28 }
0x27ca   :  { %v2797_v29 = vpop.eup %2796 }
0x27cb   :  { %v1905_v33 = vmul.f32 %v2797_v29, %v1903_v32 }
0x282e   :  { %v1908_v30 = vpop.permute.xlu1 %1907 }
0x282f   :  { %v1910_v31 = vmul.f32 %v2797_v29, %v1908_v30 }
0x2831   :  { %1912 = vrot.lane.b32.xlu0 %v1910_v31, %s2943_s5 }
0x28a3   :  { %v1913_v34 = vpop.permute.xlu0 %1912 }
0x28a4   :  { %v1915_v18 = vadd.f32 %v1913_v34, %v1905_v33 }
0x28a6   :  { %2798 = vtanh.f32 %v1915_v18 }
0x28b0   :  { %v2799_v35 = vpop.eup %2798 }
0x28b1   :  { %1918 = vrot.lane.b32.xlu1 %v2799_v35, %s2942_s23 }
0x2923   :  { %v1919_v37 = vpop.permute.xlu1 %1918 }
0x2924   :  { %v1921_v23 = vmul.f32 %v2797_v29, %v1919_v37 }
0x2926   :  { %v1927_v38 = vrot.slane %v1921_v23, 4 }
0x2928   :  { %1928 = vrot.lane.b32.xlu0 %v1927_v38, %s2943_s5 }
0x299a   :  { %v1929_v40 = vpop.permute.xlu0 %1928 }
0x299b   :  { %2537 = vmatmul.mubr.msk.f32.vlgmr.msra.gmra.mrb[16].mxu1 %vm185_vm2, %v1929_v40 }
0x2a6e   :  { %v1998_v41 = vpop.f32.mrb[16].mxu1 }
0x2a6f   :  { %v2003_v42 = vrot.slane %v1998_v41, 2  ;;  %v2538_v43 = vpop.f32.mrb[17].mxu1 }
0x2a71   :  { %v2005_v44 = vadd.f32 %v2003_v42, %v3280_v21  ;;  %v2014_v21 = vrot.slane %v1915_v18, 6 }
0x2a73   :  { %2800 = vtanh.f32 %v2005_v44  ;;  %v2243_v46 = vmul.f32 -1.442695, %v2005_v44 }
0x2a75   :  { %2802 = vpow2.f32 %v2243_v46 }
0x2a7d   :  { %v2801_v45 = vpop.eup %2800 }
0x2a7e   :  { %2018 = vrot.lane.b32.xlu1 %v2801_v45, %s2942_s23 }
0x2a7f   :  { %v2803_v47 = vpop.eup %2802 }
0x2a80   :  { %v2009_v48 = vadd.f32 1.0, %v2803_v47 }
0x2a82   :  { %2804 = vrcp.f32 %v2009_v48 }
0x2a8c   :  { %v2805_v49 = vpop.eup %2804 }
0x2a8d   :  { %v2016_v51 = vmul.f32 %v2805_v49, %v2014_v21 }
0x2af0   :  { %v2019_v16 = vpop.permute.xlu1 %2018 }
0x2af1   :  { %v2021_v50 = vmul.f32 %v2805_v49, %v2019_v16 }
0x2af3   :  { %2023 = vrot.lane.b32.xlu0 %v2021_v50, %s2943_s5 }
0x2af7   :  { %1374 = vrot.lane.b32.xlu0 %v3301_v56, %s2943_s5 }
0x2afb   :  { %1596 = vrot.lane.b32.xlu0 %v3331_v39, %s2943_s5 }
0x2aff   :  { %1923 = vrot.lane.b32.xlu0 %v1921_v23, %s2943_s5 }
0x2b03   :  { %2156 = vrot.lane.b32.xlu0 %v3209_v52, %s2944_s1  ;;  %v2040_v52 = vld [vmem:[%s3454_s9] sm:$0xff] }
0x2b04   :  { %v2658_v59 = vpack.c.bf16 %v2041_v58, %v2040_v52 }
0x2b06   :  { %2659 = vmatprep.subr.bf16.mxu0 %v2658_v59 }
0x2b07   :  { %2661 = vmatpush3.bf16.msra.mxu0 %v2658_v59 }
0x2b65   :  { %v2024_v53 = vpop.permute.xlu0 %2023 }
0x2b66   :  { %v2026_v54 = vadd.f32 %v2024_v53, %v2016_v51 }
0x2b68   :  { %2806 = vtanh.f32 %v2026_v54 }
0x2b69   :  { %v1375_v55 = vpop.permute.xlu0 %1374 }
0x2b6a   :  { %1377 = vst.msk [vmem:[#allocation3] sm:$0xc] %vm401_vm4, %v1375_v55 }
0x2b6d   :  { %v1597_v36 = vpop.permute.xlu0 %1596 }
0x2b6e   :  { %1599 = vst.msk [vmem:[#allocation3] sm:$0xc0] %vm625_vm5, %v1597_v36 }
0x2b71   :  { %v1924_v56 = vpop.permute.xlu0 %1923 }
0x2b72   :  { %v2807_v57 = vpop.eup %2806  ;;  %1926 = vst.msk [vmem:[#allocation3 + $0x8] sm:$0x30] %vm513_vm6, %v1924_v56 }
0x2b73   :  { %2029 = vrot.lane.b32.xlu1 %v2807_v57, %s2942_s23 }
0x2b75   :  { %v2157_v39 = vpop.permute.xlu0 %2156 }
0x2b76   :  { %2159 = vst.msk [vmem:[#allocation11 - $0x6] sm:$0xc0] %vm625_vm5, %v2157_v39 }
0x2b77   :  { %1485 = vrot.lane.b32.xlu1 %v3316_v17, %s2943_s5  ;;  %v2043_v17 = vld [vmem:[%s3454_s9 + $0x18] sm:$0xff]  ;;  %s2945_s9 = smov [#allocation10]  }
0x2b78   :  { %v2662_v60 = vpack.c.bf16 %v2043_v17, %v2042_v15  ;;  %s2173_s28 = sshll.u32 %s2945_s9, 4  ;;  %s2174_s28 = int_to_ptr.vmem [resolvable:$true] %s2173_s28 }
0x2b79   :  { %s2882_s14 = scalar_lea.vmem %s2174_s28, 64  ;;  %p2887_p11 = scmp.lt.s32.totalorder %s2174_s28, %s2174_s28 }
0x2b7a   :  { %2663 = vmatprep.subr.bf16.mxu0 %v2662_v60  ;;  %p2883_p10 = scmp.ne.s32.totalorder %s2174_s28, %s2882_s14  ;;  %p2888_p12 = scmp.lt.s32.totalorder %s2882_s14, %s2882_s14 }
0x2b7b   :  { %1812 = vrot.lane.b32.xlu1 %v3357_v11, %s2943_s5  ;;  %2665 = vmatpush3.bf16.msra.mxu0 %v2662_v60 }
0x2b7c   :  { %p2889_p13 = por %p2888_p12, %p2887_p11 }
0x2b7e   :  { %p2890_p0 = pnand %p2889_p13, %p2883_p10 }
0x2be5   :  { %v2030_v62 = vpop.permute.xlu1 %2029 }
0x2be6   :  { %v2032_v63 = vmul.f32 %v2805_v49, %v2030_v62 }
0x2be8   :  { %2034 = vrot.lane.b32.xlu1 %v2032_v63, %s2943_s5 }
0x2be9   :  { %v1486_v8 = vpop.permute.xlu1 %1485 }
0x2bea   :  { %1488 = vst.msk [vmem:[#allocation3] sm:$0x30] %vm513_vm6, %v1486_v8 }
0x2bec   :  { %2161 = vrot.lane.b32.xlu1 %v2026_v54, %s2944_s1 }
0x2bed   :  { %v1813_v2 = vpop.permute.xlu1 %1812 }
0x2bee   :  { %1815 = vst.msk [vmem:[#allocation3 + $0x8] sm:$0xc] %vm401_vm4, %v1813_v2 }
0x2bf1   :  { %v2038_v4 = vld [vmem:[#allocation3] sm:$0xff] }
0x2bf2   :  { %2547 = vmatprep.mubr.msk.f32.mxu0 %vm185_vm2, %v2038_v4 }
0x2c5a   :  { %v2035_v61 = vpop.permute.xlu1 %2034 }
0x2c5b   :  { %2037 = vst.msk [vmem:[#allocation3 + $0x8] sm:$0xc0] %vm625_vm5, %v2035_v61  ;;  %2154 = vst.msk [vmem:[#allocation10 - $0x4] sm:$0xc0] %vm625_vm5, %v2035_v61 }
0x2c5e   :  { %v2162_v5 = vpop.permute.xlu1 %2161 }
0x2c5f   :  { %2165 = vst.msk [vmem:[#allocation11 - $0x4] sm:$0xc0] %vm625_vm5, %v2162_v5 }
0x2c62   :  { %v2039_v1 = vld [vmem:[#allocation3 + $0x8] sm:$0xff] }
0x2c63   :  { %2548 = vmatmul.mubr.msk.f32.vlgmr.msra.gmra.mrb[18].mxu0 %vm185_vm2, %v2039_v1 }
0x2c64   :  { %2893 = shalt.err (!%p2890_p0)
}
0x2c65   :  { %s2894_s16 = scalar_lea.hbm %s3457_s12, 64 }
0x2c66   :  { %p2895_p1 = scmp.ne.s32.totalorder %s3457_s12, %s2894_s16  ;;  %p2898_p2 = scmp.lt.u32.totalorder %s2894_s16, %s3457_s12 }
0x2c68   :  { %p2900_p3 = pnand %p2898_p2, %p2895_p1 }
0x2c6a   :  { %2903 = shalt.err (!%p2900_p3)
}
0x2c6b   :  { %s2947_s19 = smov 2   ;;  %s2904_s7 = scalar_lea.vmem %s2186_s21, 64 }
0x2c6c   :  { %2179 = dma.vmem_to_hbm [thread:$0]  %s2174_s28, 64, %s3457_s12, [#allocation6], %s2943_s5, %s2943_s5, %s2947_s19  }
0x2c6d   :  { %p2905_p4 = scmp.ne.s32.totalorder %s2186_s21, %s2904_s7  ;;  %p2909_p5 = scmp.lt.s32.totalorder %s2186_s21, %s2186_s21 }
0x2c6e   :  { %p2910_p6 = scmp.lt.s32.totalorder %s2904_s7, %s2904_s7 }
0x2c70   :  { %p2911_p7 = por %p2910_p6, %p2909_p5 }
0x2c72   :  { %p2912_p8 = pnand %p2911_p7, %p2905_p4 }
0x2c74   :  { %2915 = shalt.err (!%p2912_p8)
}
0x2c75   :  { %s2916_s2 = scalar_lea.hbm %s3458_s13, 64 }
0x2c76   :  { %p2917_p9 = scmp.ne.s32.totalorder %s3458_s13, %s2916_s2  ;;  %p2920_p10 = scmp.lt.u32.totalorder %s2916_s2, %s3458_s13 }
0x2c78   :  { %p2922_p11 = pnand %p2920_p10, %p2917_p9 }
0x2c7a   :  { %2925 = shalt.err (!%p2922_p11)
}
0x2c7b   :  { %2191 = dma.vmem_to_hbm [thread:$0]  %s2186_s21, 64, %s3458_s13, [#allocation12], %s2943_s5, %s2943_s5, %s2947_s19   ;;  %v2132_v20 = vlaneseq  ;;  %vm2149_vm8 = vcmask 490496  }
0x2c7c   :  { %v2244_v12 = vld [vmem:[%s3455_s10] ss:$0 sm:$0xff] }
0x2c7d   :  { %v2133_v22 = vand.u32 127, %v2132_v20 }
0x2c7f   :  { %vm2134_vm7 = vcmp.ge.s32.totalorder %v2133_v22, 30 }
0x2d36   :  { %v2549_v0 = vpop.f32.mrb[18].mxu0 }
0x2d37   :  { %v2129_v3 = vadd.f32 %v2549_v0, %v2244_v12  ;;  %v2123_v6 = vpop.f32.mrb[19].mxu0 }
0x2d38   :  { %v2124_v7 = vadd.f32 %v2244_v12, %v2123_v6 }
0x2d39   :  { %v2248_v9 = vmul.f32 -1.442695, %v2129_v3 }
0x2d3a   :  { %v2247_v10 = vmul.f32 -1.442695, %v2124_v7 }
0x2d3b   :  { %2808 = vpow2.f32 %v2248_v9 }
0x2d3c   :  { %2810 = vpow2.f32 %v2247_v10 }
0x2d45   :  { %v2809_v11 = vpop.eup %2808 }
0x2d46   :  { %v2811_v13 = vpop.eup %2810  ;;  %v2142_v14 = vadd.f32 1.0, %v2809_v11 }
0x2d47   :  { %v2141_v19 = vadd.f32 1.0, %v2811_v13 }
0x2d48   :  { %2812 = vrcp.f32 %v2142_v14 }
0x2d49   :  { %2814 = vrcp.f32 %v2141_v19 }
0x2d52   :  { %v2813_v24 = vpop.eup %2812 }
0x2d53   :  { %v2815_v25 = vpop.eup %2814  ;;  %v2148_v26 = vsel %vm2134_vm7, %v2813_v24, %v2129_v3 }
0x2d54   :  { %2151 = vst.msk [vmem:[%s3456_s11 + $0x8] sm:$0xff] %vm2149_vm8, %v2148_v26  ;;  %v2147_v27 = vsel %vm2134_vm7, %v2815_v25, %v2124_v7 }
0x2d55   :  { %2150 = vst.msk [vmem:[%s3456_s11] sm:$0xff] %vm2149_vm8, %v2147_v27 }
0x2d56   :  { %2930 = dma.done.wait [#allocation6], 64  }
0x2d57   :  { %2931 = vsyncadd [#allocation6], 4294967232 }
0x2d58   :  { %2932 = dma.done.wait [#allocation12], 64  }
0x2d59   :  { %2933 = vsyncadd [#allocation12], 4294967232 }
0x2d5a   :  { %2200 = vsyncpa [#allocation5], 1 }
0x2d5b   :  { %2201 = vsyncpa [#allocation8], 1 }
0x2d5c   :  { %2202 = vsyncpa [#allocation6], 1 }
0x2d5d   :  { %2203 = vsyncpa [#allocation12], 1 }

</bundles_post_ra>
